<compile_context>
chip_gen: v7x
topology: tpu7x:2x2x1
jax: 0.10.0
libtpu: 0.0.40
codegen_flags: <defaults>
</compile_context>

<pallas_src>
import functools
import math

import jax
import jax.numpy as jnp
from jax.experimental import pallas as pl
from jax.experimental.pallas import tpu as pltpu


def _layernorm(x, gamma, beta, eps=1e-5):
    # One-pass variance: var = E[x^2] - mu^2 (halves the cross-lane reduces).
    mu = jnp.mean(x, axis=-1, keepdims=True)
    var = jnp.mean(x * x, axis=-1, keepdims=True) - mu * mu
    return (x - mu) * jax.lax.rsqrt(var + eps) * gamma + beta


def transformer_block_kernel(
    vkq_ref, bias_ref,
    wqkv_ref, wo_ref, bo_ref,
    g1_ref, be1_ref,
    w1_ref, b1_ref, w2_ref, b2_ref,
    g2_ref, be2_ref,
    o_ref,
    *, heads,
):
    f32 = jnp.float32
    bf16 = jnp.bfloat16

    N, S, E3 = vkq_ref.shape
    E = E3 // 3
    hd = E // heads

    vkq = vkq_ref[...].reshape(N * S, E3)        # (NS, 3E) f32, [V | K | Q]
    q_resid = vkq[:, 2 * E:]                     # (NS, E) f32 raw-query residual

    # Fused block-diagonal [V|K|Q] projection: ONE bf16 MXU matmul, f32 acc.
    # The 1/sqrt(E) softmax scale is already folded into the Q weight block.
    pkq = jnp.dot(vkq.astype(bf16), wqkv_ref[...], preferred_element_type=f32)
    pkq_b = pkq.astype(bf16)                     # (NS, 3E) bf16 MXU operands

    def head_slice(base, h):
        # Lane slice from the projected slab, reshaped to (N, S, hd).
        return pkq_b[:, base + h * hd: base + (h + 1) * hd].reshape(N, S, hd)

    # Per-head energies (tiny MXU matmuls, batched over N), stacked along a
    # leading axis so mask + softmax run ONCE over all heads.
    energies = []
    for h in range(heads):
        qh = head_slice(2 * E, h)                # (N, S, hd)
        kh = head_slice(E, h)                    # (N, S, hd)
        energies.append(jnp.einsum("nqd,nkd->nqk", qh, kh,
                                   preferred_element_type=f32))   # (N, S, S)
    energy = jnp.stack(energies, axis=0)         # (heads, N, S, S) f32

    # masked_fill(mask == 0, -1e20): bias holds {0, -1e20}, computed in wrapper.
    bias = bias_ref[...][None]                   # (1, N, S, S) f32
    energy = jnp.where(bias < 0.0, bias, energy)

    # Single batched softmax across all heads (EUP exp + approx reciprocal).
    energy = energy - jnp.max(energy, axis=-1, keepdims=True)
    p = jnp.exp(energy)
    attn = p * pl.reciprocal(jnp.sum(p, axis=-1, keepdims=True), approx=True)
    attn_b = attn.astype(bf16)                   # (heads, N, S, S)

    # attn @ V with the head merge folded into fc_out: accumulate
    # (attn_h @ v_h) @ wo[h] into one (NS, E) accumulator (no lane concat).
    fc = None
    for h in range(heads):
        vh = head_slice(0, h)                    # (N, S, hd)
        oh = jnp.einsum("nqk,nkd->nqd", attn_b[h], vh,
                        preferred_element_type=f32)               # (N, S, hd)
        contrib = jnp.dot(oh.reshape(N * S, hd).astype(bf16), wo_ref[h],
                          preferred_element_type=f32)             # (NS, E)
        fc = contrib if fc is None else fc + contrib
    fc = fc + bo_ref[...]

    # Residual + LayerNorm1 (+ dropout == identity in eval mode).
    x = _layernorm(fc + q_resid, g1_ref[...], be1_ref[...])

    # Feed-forward: Linear -> ReLU -> Linear (bf16 MXU operands, f32 acc).
    h1 = jnp.dot(x.astype(bf16), w1_ref[...], preferred_element_type=f32) + b1_ref[...]
    h1 = jnp.maximum(h1, 0.0)
    ff = jnp.dot(h1.astype(bf16), w2_ref[...], preferred_element_type=f32) + b2_ref[...]

    # Residual + LayerNorm2 (+ dropout == identity in eval mode).
    o_ref[...] = _layernorm(ff + x, g2_ref[...], be2_ref[...]).reshape(N, S, E)


def transformer_block(value, key, query, mask, params, *, heads):
    N, S, E = query.shape
    hd = E // heads
    bf16 = jnp.bfloat16

    # Shared per-head (hd, hd) weights -> block-diagonal (E, E) blocks, fused
    # into a single (3E, 3E) [V|K|Q] projection weight.  Softmax scale folded
    # into the Q block before the bf16 cast (exponent-only change).
    eye = jnp.eye(heads, dtype=jnp.float32)
    wv_bd = jnp.kron(eye, params["wv_t"])
    wk_bd = jnp.kron(eye, params["wk_t"])
    wq_bd = jnp.kron(eye, params["wq_t"]) * jnp.float32(1.0 / math.sqrt(E))
    wqkv = jnp.zeros((3 * E, 3 * E), jnp.float32)
    wqkv = wqkv.at[:E, :E].set(wv_bd)
    wqkv = wqkv.at[E:2 * E, E:2 * E].set(wk_bd)
    wqkv = wqkv.at[2 * E:, 2 * E:].set(wq_bd)
    wqkv = wqkv.astype(bf16)

    # fc_out weight pre-split per head: wo3[h] == wo_t[h*hd:(h+1)*hd, :].
    wo3 = params["wo_t"].reshape(heads, hd, E).astype(bf16)

    param_list = [
        wqkv, wo3, params["bo"],
        params["ln1_g"], params["ln1_b"],
        params["w1_t"].astype(bf16), params["b1"],
        params["w2_t"].astype(bf16), params["b2"],
        params["ln2_g"], params["ln2_b"],
    ]

    # One fused activation slab, and the mask pre-converted to an f32 fill
    # value (0 / -1e20) so the kernel does a single select.
    vkq = jnp.concatenate([value, key, query], axis=-1)              # (N, S, 3E)
    bias = jnp.where(mask == 0, -1e20, 0.0).astype(jnp.float32)      # (N, S, S)

    def full_spec(x):
        nd = x.ndim
        return pl.BlockSpec(x.shape, lambda i, _nd=nd: (0,) * _nd)

    in_specs = [full_spec(vkq), full_spec(bias)] + [full_spec(p) for p in param_list]

    # Single grid step: the whole problem is a handful of vregs, so per-step
    # grid/pipeline overhead would dominate.  (Weight multi-buffering and
    # parallel dimension semantics are irrelevant with one step.)
    return pl.pallas_call(
        functools.partial(transformer_block_kernel, heads=heads),
        out_shape=jax.ShapeDtypeStruct((N, S, E), jnp.float32),
        grid_spec=pltpu.PrefetchScalarGridSpec(
            num_scalar_prefetch=0,
            grid=(1,),
            in_specs=in_specs,
            out_specs=pl.BlockSpec((N, S, E), lambda i: (0, 0, 0)),
        ),
        compiler_params=pltpu.CompilerParams(
            dimension_semantics=("arbitrary",),
            vmem_limit_bytes=32 * 1024 * 1024,
        ),
    )(vkq, bias, *param_list)


# -------------------- pure-JAX f32 reference (for verification) --------------------
def reference(value, key, query, mask, params, *, heads):
    N, S, E = query.shape
    hd = E // heads

    def per_head_linear(x, w_t):
        xh = x.reshape(N, S, heads, hd)
        return jnp.einsum("nshd,de->nshe", xh, w_t)

    q = per_head_linear(query, params["wq_t"])
    k = per_head_linear(key, params["wk_t"])
    v = per_head_linear(value, params["wv_t"])

    energy = jnp.einsum("nqhd,nkhd->nhqk", q, k)
    energy = jnp.where(mask[:, None, :, :] == 0, -1e20, energy)
    attn = jax.nn.softmax(energy / math.sqrt(E), axis=3)
    out = jnp.einsum("nhqk,nkhd->nqhd", attn, v).reshape(N, S, E)
    out = out @ params["wo_t"] + params["bo"]

    def ln(x, g, b):
        mu = jnp.mean(x, axis=-1, keepdims=True)
        var = jnp.mean((x - mu) ** 2, axis=-1, keepdims=True)
        return (x - mu) / jnp.sqrt(var + 1e-5) * g + b

    x = ln(out + query, params["ln1_g"], params["ln1_b"])
    h = jnp.maximum(x @ params["w1_t"] + params["b1"], 0.0)
    ff = h @ params["w2_t"] + params["b2"]
    return ln(ff + x, params["ln2_g"], params["ln2_b"])


if __name__ == "__main__":
    # Small shapes: batch=2, seq=8, embed=32, heads=4 (head_dim=8), expansion=2.
    N, S, E, heads, expansion = 2, 8, 32, 4, 2
    hd = E // heads
    H = expansion * E

    key0 = jax.random.PRNGKey(0)
    ks = jax.random.split(key0, 12)

    def init(k, shape, fan_in):
        lim = 1.0 / math.sqrt(fan_in)
        return jax.random.uniform(k, shape, jnp.float32, -lim, lim)

    # nn.Linear weights are (out, in); store transposed (in, out).
    params = {
        "wv_t": init(ks[0], (hd, hd), hd).T,
        "wk_t": init(ks[1], (hd, hd), hd).T,
        "wq_t": init(ks[2], (hd, hd), hd).T,
        "wo_t": init(ks[3], (E, E), E).T,
        "bo":   init(ks[4], (1, E), E),
        "ln1_g": jnp.ones((1, E), jnp.float32),
        "ln1_b": jnp.zeros((1, E), jnp.float32),
        "w1_t": init(ks[5], (H, E), E).T,
        "b1":   init(ks[6], (1, H), E),
        "w2_t": init(ks[7], (E, H), H).T,
        "b2":   init(ks[8], (1, E), H),
        "ln2_g": jnp.ones((1, E), jnp.float32),
        "ln2_b": jnp.zeros((1, E), jnp.float32),
    }

    value = jax.random.normal(ks[9], (N, S, E), jnp.float32)
    key_in = jax.random.normal(ks[10], (N, S, E), jnp.float32)
    query = jax.random.normal(ks[11], (N, S, E), jnp.float32)
    # Causal 0/1 mask, broadcast over heads (mask==0 positions get -1e20).
    mask = jnp.tril(jnp.ones((S, S), jnp.float32))[None].repeat(N, axis=0)

    # TODO(synk): dropout is implemented as identity (eval-mode); training-mode
    # stochastic dropout would need pltpu.prng_* inside the kernel.

    out = transformer_block(value, key_in, query, mask, params, heads=heads)
    out = jax.block_until_ready(out)

    ref = reference(value, key_in, query, mask, params, heads=heads)
    assert out.shape == (N, S, E)
    # Tolerance relaxed vs the f32 reference for bf16 MXU operands + approx recip.
    assert jnp.allclose(out, ref, rtol=2e-2, atol=2e-2), "mismatch vs reference"

    print("KERNEL_OK")
</pallas_src>

<mosaic_0001>
module attributes {stable_mosaic.version = 11 : i64} {
  func.func @transformer_block_kernel(%arg0: i32, %arg1: memref<2x8x96xf32, #tpu.memory_space<vmem>>, %arg2: memref<2x8x8xf32, #tpu.memory_space<vmem>>, %arg3: memref<96x96xbf16, #tpu.memory_space<vmem>>, %arg4: memref<4x8x32xbf16, #tpu.memory_space<vmem>>, %arg5: memref<1x32xf32, #tpu.memory_space<vmem>>, %arg6: memref<1x32xf32, #tpu.memory_space<vmem>>, %arg7: memref<1x32xf32, #tpu.memory_space<vmem>>, %arg8: memref<32x64xbf16, #tpu.memory_space<vmem>>, %arg9: memref<1x64xf32, #tpu.memory_space<vmem>>, %arg10: memref<64x32xbf16, #tpu.memory_space<vmem>>, %arg11: memref<1x32xf32, #tpu.memory_space<vmem>>, %arg12: memref<1x32xf32, #tpu.memory_space<vmem>>, %arg13: memref<1x32xf32, #tpu.memory_space<vmem>>, %arg14: memref<2x8x32xf32, #tpu.memory_space<vmem>>) attributes {dimension_semantics = [#tpu.dimension_semantics<arbitrary>], iteration_bounds = array<i64: 1>, scalar_prefetch = 0 : i64, scratch_operands = 0 : i64, tpu.core_type = #tpu.core_type<tc>, window_params = [{pipeline_mode = #tpu.pipeline_mode<synchronous>, transform_indices = @transform_0, window_bounds = array<i64: 2, 8, 96>}, {pipeline_mode = #tpu.pipeline_mode<synchronous>, transform_indices = @transform_1, window_bounds = array<i64: 2, 8, 8>}, {pipeline_mode = #tpu.pipeline_mode<synchronous>, transform_indices = @transform_2, window_bounds = array<i64: 96, 96>}, {pipeline_mode = #tpu.pipeline_mode<synchronous>, transform_indices = @transform_3, window_bounds = array<i64: 4, 8, 32>}, {pipeline_mode = #tpu.pipeline_mode<synchronous>, transform_indices = @transform_4, window_bounds = array<i64: 1, 32>}, {pipeline_mode = #tpu.pipeline_mode<synchronous>, transform_indices = @transform_5, window_bounds = array<i64: 1, 32>}, {pipeline_mode = #tpu.pipeline_mode<synchronous>, transform_indices = @transform_6, window_bounds = array<i64: 1, 32>}, {pipeline_mode = #tpu.pipeline_mode<synchronous>, transform_indices = @transform_7, window_bounds = array<i64: 32, 64>}, {pipeline_mode = #tpu.pipeline_mode<synchronous>, transform_indices = @transform_8, window_bounds = array<i64: 1, 64>}, {pipeline_mode = #tpu.pipeline_mode<synchronous>, transform_indices = @transform_9, window_bounds = array<i64: 64, 32>}, {pipeline_mode = #tpu.pipeline_mode<synchronous>, transform_indices = @transform_10, window_bounds = array<i64: 1, 32>}, {pipeline_mode = #tpu.pipeline_mode<synchronous>, transform_indices = @transform_11, window_bounds = array<i64: 1, 32>}, {pipeline_mode = #tpu.pipeline_mode<synchronous>, transform_indices = @transform_12, window_bounds = array<i64: 1, 32>}, {pipeline_mode = #tpu.pipeline_mode<synchronous>, transform_indices = @transform_13, window_bounds = array<i64: 2, 8, 32>}]} {
    %c0 = arith.constant 0 : index
    %c0_0 = arith.constant 0 : index
    %c0_1 = arith.constant 0 : index
    %0 = vector.load %arg1[%c0, %c0_0, %c0_1] : memref<2x8x96xf32, #tpu.memory_space<vmem>>, vector<2x8x96xf32>
    %1 = vector.shape_cast %0 : vector<2x8x96xf32> to vector<16x96xf32>
    %2 = vector.extract_strided_slice %1 {offsets = [0, 64], sizes = [16, 32], strides = [1, 1]} : vector<16x96xf32> to vector<16x32xf32>
    %3 = arith.truncf %1 : vector<16x96xf32> to vector<16x96xbf16>
    %c0_2 = arith.constant 0 : index
    %c0_3 = arith.constant 0 : index
    %4 = vector.load %arg3[%c0_2, %c0_3] : memref<96x96xbf16, #tpu.memory_space<vmem>>, vector<96x96xbf16>
    %cst = arith.constant dense<0.000000e+00> : vector<16x96xf32>
    %5 = tpu.matmul %3, %4, %cst {dimension_numbers = #tpu.dot_dimension_numbers<[1], [0], [0], [1], [0, 0, 1, 1], [], []>} : vector<16x96xbf16>, vector<96x96xbf16>, vector<16x96xf32> -> vector<16x96xf32>
    %6 = arith.truncf %5 : vector<16x96xf32> to vector<16x96xbf16>
    %7 = vector.extract_strided_slice %6 {offsets = [0, 64], sizes = [16, 8], strides = [1, 1]} : vector<16x96xbf16> to vector<16x8xbf16>
    %8 = vector.shape_cast %7 : vector<16x8xbf16> to vector<2x8x8xbf16>
    %9 = vector.extract_strided_slice %6 {offsets = [0, 32], sizes = [16, 8], strides = [1, 1]} : vector<16x96xbf16> to vector<16x8xbf16>
    %10 = vector.shape_cast %9 : vector<16x8xbf16> to vector<2x8x8xbf16>
    "tpu.trace_start"() <{level = 10 : i32, message = "nqd,nkd->nqk"}> : () -> ()
    %cst_4 = arith.constant dense<0.000000e+00> : vector<2x8x8xf32>
    %11 = tpu.matmul %8, %10, %cst_4 {dimension_numbers = #tpu.dot_dimension_numbers<[2], [2], [1], [1], [0, 0, 0, 1, 1, 1], [0], [0]>} : vector<2x8x8xbf16>, vector<2x8x8xbf16>, vector<2x8x8xf32> -> vector<2x8x8xf32>
    "tpu.trace_stop"() : () -> ()
    %12 = vector.extract_strided_slice %6 {offsets = [0, 72], sizes = [16, 8], strides = [1, 1]} : vector<16x96xbf16> to vector<16x8xbf16>
    %13 = vector.shape_cast %12 : vector<16x8xbf16> to vector<2x8x8xbf16>
    %14 = vector.extract_strided_slice %6 {offsets = [0, 40], sizes = [16, 8], strides = [1, 1]} : vector<16x96xbf16> to vector<16x8xbf16>
    %15 = vector.shape_cast %14 : vector<16x8xbf16> to vector<2x8x8xbf16>
    "tpu.trace_start"() <{level = 10 : i32, message = "nqd,nkd->nqk"}> : () -> ()
    %cst_5 = arith.constant dense<0.000000e+00> : vector<2x8x8xf32>
    %16 = tpu.matmul %13, %15, %cst_5 {dimension_numbers = #tpu.dot_dimension_numbers<[2], [2], [1], [1], [0, 0, 0, 1, 1, 1], [0], [0]>} : vector<2x8x8xbf16>, vector<2x8x8xbf16>, vector<2x8x8xf32> -> vector<2x8x8xf32>
    "tpu.trace_stop"() : () -> ()
    %17 = vector.extract_strided_slice %6 {offsets = [0, 80], sizes = [16, 8], strides = [1, 1]} : vector<16x96xbf16> to vector<16x8xbf16>
    %18 = vector.shape_cast %17 : vector<16x8xbf16> to vector<2x8x8xbf16>
    %19 = vector.extract_strided_slice %6 {offsets = [0, 48], sizes = [16, 8], strides = [1, 1]} : vector<16x96xbf16> to vector<16x8xbf16>
    %20 = vector.shape_cast %19 : vector<16x8xbf16> to vector<2x8x8xbf16>
    "tpu.trace_start"() <{level = 10 : i32, message = "nqd,nkd->nqk"}> : () -> ()
    %cst_6 = arith.constant dense<0.000000e+00> : vector<2x8x8xf32>
    %21 = tpu.matmul %18, %20, %cst_6 {dimension_numbers = #tpu.dot_dimension_numbers<[2], [2], [1], [1], [0, 0, 0, 1, 1, 1], [0], [0]>} : vector<2x8x8xbf16>, vector<2x8x8xbf16>, vector<2x8x8xf32> -> vector<2x8x8xf32>
    "tpu.trace_stop"() : () -> ()
    %22 = vector.extract_strided_slice %6 {offsets = [0, 88], sizes = [16, 8], strides = [1, 1]} : vector<16x96xbf16> to vector<16x8xbf16>
    %23 = vector.shape_cast %22 : vector<16x8xbf16> to vector<2x8x8xbf16>
    %24 = vector.extract_strided_slice %6 {offsets = [0, 56], sizes = [16, 8], strides = [1, 1]} : vector<16x96xbf16> to vector<16x8xbf16>
    %25 = vector.shape_cast %24 : vector<16x8xbf16> to vector<2x8x8xbf16>
    "tpu.trace_start"() <{level = 10 : i32, message = "nqd,nkd->nqk"}> : () -> ()
    %cst_7 = arith.constant dense<0.000000e+00> : vector<2x8x8xf32>
    %26 = tpu.matmul %23, %25, %cst_7 {dimension_numbers = #tpu.dot_dimension_numbers<[2], [2], [1], [1], [0, 0, 0, 1, 1, 1], [0], [0]>} : vector<2x8x8xbf16>, vector<2x8x8xbf16>, vector<2x8x8xf32> -> vector<2x8x8xf32>
    "tpu.trace_stop"() : () -> ()
    %27 = vector.shape_cast %11 : vector<2x8x8xf32> to vector<1x2x8x8xf32>
    %28 = vector.shape_cast %16 : vector<2x8x8xf32> to vector<1x2x8x8xf32>
    %29 = vector.shape_cast %21 : vector<2x8x8xf32> to vector<1x2x8x8xf32>
    %30 = vector.shape_cast %26 : vector<2x8x8xf32> to vector<1x2x8x8xf32>
    %31 = tpu.concatenate %27, %28, %29, %30 in 0 : vector<1x2x8x8xf32>, vector<1x2x8x8xf32>, vector<1x2x8x8xf32>, vector<1x2x8x8xf32> -> vector<4x2x8x8xf32>
    %c0_8 = arith.constant 0 : index
    %c0_9 = arith.constant 0 : index
    %c0_10 = arith.constant 0 : index
    %32 = vector.load %arg2[%c0_8, %c0_9, %c0_10] : memref<2x8x8xf32, #tpu.memory_space<vmem>>, vector<2x8x8xf32>
    %33 = vector.shape_cast %32 : vector<2x8x8xf32> to vector<1x2x8x8xf32>
    %cst_11 = arith.constant 0.000000e+00 : f32
    %34 = vector.broadcast %cst_11 : f32 to vector<1x2x8x8xf32>
    %35 = arith.cmpf olt, %33, %34 : vector<1x2x8x8xf32>
    %36 = vector.shape_cast %35 : vector<1x2x8x8xi1> to vector<1x2x8x8xi1>
    %37 = vector.broadcast %36 : vector<1x2x8x8xi1> to vector<4x2x8x8xi1>
    %38 = vector.shape_cast %33 : vector<1x2x8x8xf32> to vector<1x2x8x8xf32>
    %39 = vector.broadcast %38 : vector<1x2x8x8xf32> to vector<4x2x8x8xf32>
    %40 = arith.select %37, %39, %31 : vector<4x2x8x8xi1>, vector<4x2x8x8xf32>
    %cst_12 = arith.constant dense<0xFF800000> : vector<4x2x8xf32>
    %41 = vector.multi_reduction <maximumf>, %40, %cst_12 [3] : vector<4x2x8x8xf32> to vector<4x2x8xf32>
    %42 = vector.shape_cast %41 : vector<4x2x8xf32> to vector<4x2x8x1xf32>
    %43 = vector.broadcast %42 : vector<4x2x8x1xf32> to vector<4x2x8x8xf32>
    %44 = arith.subf %40, %43 : vector<4x2x8x8xf32>
    %45 = math.exp %44 : vector<4x2x8x8xf32>
    %cst_13 = arith.constant dense<0.000000e+00> : vector<4x2x8xf32>
    %46 = vector.multi_reduction <add>, %45, %cst_13 [3] : vector<4x2x8x8xf32> to vector<4x2x8xf32>
    %47 = vector.shape_cast %46 : vector<4x2x8xf32> to vector<4x2x8x1xf32>
    %48 = tpu.reciprocal %47 {approx = true} : vector<4x2x8x1xf32> -> vector<4x2x8x1xf32>
    %49 = vector.broadcast %48 : vector<4x2x8x1xf32> to vector<4x2x8x8xf32>
    %50 = arith.mulf %45, %49 : vector<4x2x8x8xf32>
    %51 = arith.truncf %50 : vector<4x2x8x8xf32> to vector<4x2x8x8xbf16>
    %52 = vector.extract_strided_slice %6 {offsets = [0, 0], sizes = [16, 8], strides = [1, 1]} : vector<16x96xbf16> to vector<16x8xbf16>
    %53 = vector.shape_cast %52 : vector<16x8xbf16> to vector<2x8x8xbf16>
    %54 = vector.extract_strided_slice %51 {offsets = [0, 0, 0, 0], sizes = [1, 2, 8, 8], strides = [1, 1, 1, 1]} : vector<4x2x8x8xbf16> to vector<1x2x8x8xbf16>
    %55 = vector.shape_cast %54 : vector<1x2x8x8xbf16> to vector<2x8x8xbf16>
    "tpu.trace_start"() <{level = 10 : i32, message = "nqk,nkd->nqd"}> : () -> ()
    %cst_14 = arith.constant dense<0.000000e+00> : vector<2x8x8xf32>
    %56 = tpu.matmul %55, %53, %cst_14 {dimension_numbers = #tpu.dot_dimension_numbers<[2], [1], [1], [2], [0, 0, 0, 1, 1, 2], [0], [0]>} : vector<2x8x8xbf16>, vector<2x8x8xbf16>, vector<2x8x8xf32> -> vector<2x8x8xf32>
    "tpu.trace_stop"() : () -> ()
    %57 = vector.shape_cast %56 : vector<2x8x8xf32> to vector<16x8xf32>
    %58 = arith.truncf %57 : vector<16x8xf32> to vector<16x8xbf16>
    %c0_15 = arith.constant 0 : index
    %c0_16 = arith.constant 0 : index
    %c0_17 = arith.constant 0 : index
    %59 = vector.load %arg4[%c0_15, %c0_16, %c0_17] : memref<4x8x32xbf16, #tpu.memory_space<vmem>>, vector<1x8x32xbf16>
    %60 = vector.shape_cast %59 : vector<1x8x32xbf16> to vector<8x32xbf16>
    %cst_18 = arith.constant dense<0.000000e+00> : vector<16x32xf32>
    %61 = tpu.matmul %58, %60, %cst_18 {dimension_numbers = #tpu.dot_dimension_numbers<[1], [0], [0], [1], [0, 0, 1, 1], [], []>} : vector<16x8xbf16>, vector<8x32xbf16>, vector<16x32xf32> -> vector<16x32xf32>
    %62 = vector.extract_strided_slice %6 {offsets = [0, 8], sizes = [16, 8], strides = [1, 1]} : vector<16x96xbf16> to vector<16x8xbf16>
    %63 = vector.shape_cast %62 : vector<16x8xbf16> to vector<2x8x8xbf16>
    %64 = vector.extract_strided_slice %51 {offsets = [1, 0, 0, 0], sizes = [1, 2, 8, 8], strides = [1, 1, 1, 1]} : vector<4x2x8x8xbf16> to vector<1x2x8x8xbf16>
    %65 = vector.shape_cast %64 : vector<1x2x8x8xbf16> to vector<2x8x8xbf16>
    "tpu.trace_start"() <{level = 10 : i32, message = "nqk,nkd->nqd"}> : () -> ()
    %cst_19 = arith.constant dense<0.000000e+00> : vector<2x8x8xf32>
    %66 = tpu.matmul %65, %63, %cst_19 {dimension_numbers = #tpu.dot_dimension_numbers<[2], [1], [1], [2], [0, 0, 0, 1, 1, 2], [0], [0]>} : vector<2x8x8xbf16>, vector<2x8x8xbf16>, vector<2x8x8xf32> -> vector<2x8x8xf32>
    "tpu.trace_stop"() : () -> ()
    %67 = vector.shape_cast %66 : vector<2x8x8xf32> to vector<16x8xf32>
    %68 = arith.truncf %67 : vector<16x8xf32> to vector<16x8xbf16>
    %c1 = arith.constant 1 : index
    %c0_20 = arith.constant 0 : index
    %c0_21 = arith.constant 0 : index
    %69 = vector.load %arg4[%c1, %c0_20, %c0_21] : memref<4x8x32xbf16, #tpu.memory_space<vmem>>, vector<1x8x32xbf16>
    %70 = vector.shape_cast %69 : vector<1x8x32xbf16> to vector<8x32xbf16>
    %cst_22 = arith.constant dense<0.000000e+00> : vector<16x32xf32>
    %71 = tpu.matmul %68, %70, %cst_22 {dimension_numbers = #tpu.dot_dimension_numbers<[1], [0], [0], [1], [0, 0, 1, 1], [], []>} : vector<16x8xbf16>, vector<8x32xbf16>, vector<16x32xf32> -> vector<16x32xf32>
    %72 = arith.addf %61, %71 : vector<16x32xf32>
    %73 = vector.extract_strided_slice %6 {offsets = [0, 16], sizes = [16, 8], strides = [1, 1]} : vector<16x96xbf16> to vector<16x8xbf16>
    %74 = vector.shape_cast %73 : vector<16x8xbf16> to vector<2x8x8xbf16>
    %75 = vector.extract_strided_slice %51 {offsets = [2, 0, 0, 0], sizes = [1, 2, 8, 8], strides = [1, 1, 1, 1]} : vector<4x2x8x8xbf16> to vector<1x2x8x8xbf16>
    %76 = vector.shape_cast %75 : vector<1x2x8x8xbf16> to vector<2x8x8xbf16>
    "tpu.trace_start"() <{level = 10 : i32, message = "nqk,nkd->nqd"}> : () -> ()
    %cst_23 = arith.constant dense<0.000000e+00> : vector<2x8x8xf32>
    %77 = tpu.matmul %76, %74, %cst_23 {dimension_numbers = #tpu.dot_dimension_numbers<[2], [1], [1], [2], [0, 0, 0, 1, 1, 2], [0], [0]>} : vector<2x8x8xbf16>, vector<2x8x8xbf16>, vector<2x8x8xf32> -> vector<2x8x8xf32>
    "tpu.trace_stop"() : () -> ()
    %78 = vector.shape_cast %77 : vector<2x8x8xf32> to vector<16x8xf32>
    %79 = arith.truncf %78 : vector<16x8xf32> to vector<16x8xbf16>
    %c2 = arith.constant 2 : index
    %c0_24 = arith.constant 0 : index
    %c0_25 = arith.constant 0 : index
    %80 = vector.load %arg4[%c2, %c0_24, %c0_25] : memref<4x8x32xbf16, #tpu.memory_space<vmem>>, vector<1x8x32xbf16>
    %81 = vector.shape_cast %80 : vector<1x8x32xbf16> to vector<8x32xbf16>
    %cst_26 = arith.constant dense<0.000000e+00> : vector<16x32xf32>
    %82 = tpu.matmul %79, %81, %cst_26 {dimension_numbers = #tpu.dot_dimension_numbers<[1], [0], [0], [1], [0, 0, 1, 1], [], []>} : vector<16x8xbf16>, vector<8x32xbf16>, vector<16x32xf32> -> vector<16x32xf32>
    %83 = arith.addf %72, %82 : vector<16x32xf32>
    %84 = vector.extract_strided_slice %6 {offsets = [0, 24], sizes = [16, 8], strides = [1, 1]} : vector<16x96xbf16> to vector<16x8xbf16>
    %85 = vector.shape_cast %84 : vector<16x8xbf16> to vector<2x8x8xbf16>
    %86 = vector.extract_strided_slice %51 {offsets = [3, 0, 0, 0], sizes = [1, 2, 8, 8], strides = [1, 1, 1, 1]} : vector<4x2x8x8xbf16> to vector<1x2x8x8xbf16>
    %87 = vector.shape_cast %86 : vector<1x2x8x8xbf16> to vector<2x8x8xbf16>
    "tpu.trace_start"() <{level = 10 : i32, message = "nqk,nkd->nqd"}> : () -> ()
    %cst_27 = arith.constant dense<0.000000e+00> : vector<2x8x8xf32>
    %88 = tpu.matmul %87, %85, %cst_27 {dimension_numbers = #tpu.dot_dimension_numbers<[2], [1], [1], [2], [0, 0, 0, 1, 1, 2], [0], [0]>} : vector<2x8x8xbf16>, vector<2x8x8xbf16>, vector<2x8x8xf32> -> vector<2x8x8xf32>
    "tpu.trace_stop"() : () -> ()
    %89 = vector.shape_cast %88 : vector<2x8x8xf32> to vector<16x8xf32>
    %90 = arith.truncf %89 : vector<16x8xf32> to vector<16x8xbf16>
    %c3 = arith.constant 3 : index
    %c0_28 = arith.constant 0 : index
    %c0_29 = arith.constant 0 : index
    %91 = vector.load %arg4[%c3, %c0_28, %c0_29] : memref<4x8x32xbf16, #tpu.memory_space<vmem>>, vector<1x8x32xbf16>
    %92 = vector.shape_cast %91 : vector<1x8x32xbf16> to vector<8x32xbf16>
    %cst_30 = arith.constant dense<0.000000e+00> : vector<16x32xf32>
    %93 = tpu.matmul %90, %92, %cst_30 {dimension_numbers = #tpu.dot_dimension_numbers<[1], [0], [0], [1], [0, 0, 1, 1], [], []>} : vector<16x8xbf16>, vector<8x32xbf16>, vector<16x32xf32> -> vector<16x32xf32>
    %94 = arith.addf %83, %93 : vector<16x32xf32>
    %c0_31 = arith.constant 0 : index
    %c0_32 = arith.constant 0 : index
    %95 = vector.load %arg5[%c0_31, %c0_32] : memref<1x32xf32, #tpu.memory_space<vmem>>, vector<1x32xf32>
    %96 = vector.broadcast %95 : vector<1x32xf32> to vector<16x32xf32>
    %97 = arith.addf %94, %96 : vector<16x32xf32>
    %98 = arith.addf %97, %2 : vector<16x32xf32>
    %c0_33 = arith.constant 0 : index
    %c0_34 = arith.constant 0 : index
    %99 = vector.load %arg6[%c0_33, %c0_34] : memref<1x32xf32, #tpu.memory_space<vmem>>, vector<1x32xf32>
    %c0_35 = arith.constant 0 : index
    %c0_36 = arith.constant 0 : index
    %100 = vector.load %arg7[%c0_35, %c0_36] : memref<1x32xf32, #tpu.memory_space<vmem>>, vector<1x32xf32>
    %cst_37 = arith.constant dense<0.000000e+00> : vector<16xf32>
    %101 = vector.multi_reduction <add>, %98, %cst_37 [1] : vector<16x32xf32> to vector<16xf32>
    %102 = vector.shape_cast %101 : vector<16xf32> to vector<16x1xf32>
    %cst_38 = arith.constant 3.200000e+01 : f32
    %103 = vector.broadcast %cst_38 : f32 to vector<16x1xf32>
    %104 = arith.divf %102, %103 : vector<16x1xf32>
    %105 = arith.mulf %98, %98 : vector<16x32xf32>
    %cst_39 = arith.constant dense<0.000000e+00> : vector<16xf32>
    %106 = vector.multi_reduction <add>, %105, %cst_39 [1] : vector<16x32xf32> to vector<16xf32>
    %107 = vector.shape_cast %106 : vector<16xf32> to vector<16x1xf32>
    %cst_40 = arith.constant 3.200000e+01 : f32
    %108 = vector.broadcast %cst_40 : f32 to vector<16x1xf32>
    %109 = arith.divf %107, %108 : vector<16x1xf32>
    %110 = arith.mulf %104, %104 : vector<16x1xf32>
    %111 = arith.subf %109, %110 : vector<16x1xf32>
    %112 = vector.broadcast %104 : vector<16x1xf32> to vector<16x32xf32>
    %113 = arith.subf %98, %112 : vector<16x32xf32>
    %cst_41 = arith.constant 9.99999974E-6 : f32
    %114 = vector.broadcast %cst_41 : f32 to vector<16x1xf32>
    %115 = arith.addf %111, %114 : vector<16x1xf32>
    %116 = math.rsqrt %115 : vector<16x1xf32>
    %117 = vector.broadcast %116 : vector<16x1xf32> to vector<16x32xf32>
    %118 = arith.mulf %113, %117 : vector<16x32xf32>
    %119 = vector.broadcast %99 : vector<1x32xf32> to vector<16x32xf32>
    %120 = arith.mulf %118, %119 : vector<16x32xf32>
    %121 = vector.broadcast %100 : vector<1x32xf32> to vector<16x32xf32>
    %122 = arith.addf %120, %121 : vector<16x32xf32>
    %123 = arith.truncf %122 : vector<16x32xf32> to vector<16x32xbf16>
    %c0_42 = arith.constant 0 : index
    %c0_43 = arith.constant 0 : index
    %124 = vector.load %arg8[%c0_42, %c0_43] : memref<32x64xbf16, #tpu.memory_space<vmem>>, vector<32x64xbf16>
    %cst_44 = arith.constant dense<0.000000e+00> : vector<16x64xf32>
    %125 = tpu.matmul %123, %124, %cst_44 {dimension_numbers = #tpu.dot_dimension_numbers<[1], [0], [0], [1], [0, 0, 1, 1], [], []>} : vector<16x32xbf16>, vector<32x64xbf16>, vector<16x64xf32> -> vector<16x64xf32>
    %c0_45 = arith.constant 0 : index
    %c0_46 = arith.constant 0 : index
    %126 = vector.load %arg9[%c0_45, %c0_46] : memref<1x64xf32, #tpu.memory_space<vmem>>, vector<1x64xf32>
    %127 = vector.broadcast %126 : vector<1x64xf32> to vector<16x64xf32>
    %128 = arith.addf %125, %127 : vector<16x64xf32>
    %cst_47 = arith.constant 0.000000e+00 : f32
    %129 = vector.broadcast %cst_47 : f32 to vector<16x64xf32>
    %130 = arith.maximumf %128, %129 : vector<16x64xf32>
    %131 = arith.truncf %130 : vector<16x64xf32> to vector<16x64xbf16>
    %c0_48 = arith.constant 0 : index
    %c0_49 = arith.constant 0 : index
    %132 = vector.load %arg10[%c0_48, %c0_49] : memref<64x32xbf16, #tpu.memory_space<vmem>>, vector<64x32xbf16>
    %cst_50 = arith.constant dense<0.000000e+00> : vector<16x32xf32>
    %133 = tpu.matmul %131, %132, %cst_50 {dimension_numbers = #tpu.dot_dimension_numbers<[1], [0], [0], [1], [0, 0, 1, 1], [], []>} : vector<16x64xbf16>, vector<64x32xbf16>, vector<16x32xf32> -> vector<16x32xf32>
    %c0_51 = arith.constant 0 : index
    %c0_52 = arith.constant 0 : index
    %134 = vector.load %arg11[%c0_51, %c0_52] : memref<1x32xf32, #tpu.memory_space<vmem>>, vector<1x32xf32>
    %135 = vector.broadcast %134 : vector<1x32xf32> to vector<16x32xf32>
    %136 = arith.addf %133, %135 : vector<16x32xf32>
    %137 = arith.addf %136, %122 : vector<16x32xf32>
    %c0_53 = arith.constant 0 : index
    %c0_54 = arith.constant 0 : index
    %138 = vector.load %arg12[%c0_53, %c0_54] : memref<1x32xf32, #tpu.memory_space<vmem>>, vector<1x32xf32>
    %c0_55 = arith.constant 0 : index
    %c0_56 = arith.constant 0 : index
    %139 = vector.load %arg13[%c0_55, %c0_56] : memref<1x32xf32, #tpu.memory_space<vmem>>, vector<1x32xf32>
    %cst_57 = arith.constant dense<0.000000e+00> : vector<16xf32>
    %140 = vector.multi_reduction <add>, %137, %cst_57 [1] : vector<16x32xf32> to vector<16xf32>
    %141 = vector.shape_cast %140 : vector<16xf32> to vector<16x1xf32>
    %cst_58 = arith.constant 3.200000e+01 : f32
    %142 = vector.broadcast %cst_58 : f32 to vector<16x1xf32>
    %143 = arith.divf %141, %142 : vector<16x1xf32>
    %144 = arith.mulf %137, %137 : vector<16x32xf32>
    %cst_59 = arith.constant dense<0.000000e+00> : vector<16xf32>
    %145 = vector.multi_reduction <add>, %144, %cst_59 [1] : vector<16x32xf32> to vector<16xf32>
    %146 = vector.shape_cast %145 : vector<16xf32> to vector<16x1xf32>
    %cst_60 = arith.constant 3.200000e+01 : f32
    %147 = vector.broadcast %cst_60 : f32 to vector<16x1xf32>
    %148 = arith.divf %146, %147 : vector<16x1xf32>
    %149 = arith.mulf %143, %143 : vector<16x1xf32>
    %150 = arith.subf %148, %149 : vector<16x1xf32>
    %151 = vector.broadcast %143 : vector<16x1xf32> to vector<16x32xf32>
    %152 = arith.subf %137, %151 : vector<16x32xf32>
    %cst_61 = arith.constant 9.99999974E-6 : f32
    %153 = vector.broadcast %cst_61 : f32 to vector<16x1xf32>
    %154 = arith.addf %150, %153 : vector<16x1xf32>
    %155 = math.rsqrt %154 : vector<16x1xf32>
    %156 = vector.broadcast %155 : vector<16x1xf32> to vector<16x32xf32>
    %157 = arith.mulf %152, %156 : vector<16x32xf32>
    %158 = vector.broadcast %138 : vector<1x32xf32> to vector<16x32xf32>
    %159 = arith.mulf %157, %158 : vector<16x32xf32>
    %160 = vector.broadcast %139 : vector<1x32xf32> to vector<16x32xf32>
    %161 = arith.addf %159, %160 : vector<16x32xf32>
    %162 = vector.shape_cast %161 : vector<16x32xf32> to vector<2x8x32xf32>
    %c0_62 = arith.constant 0 : index
    %c0_63 = arith.constant 0 : index
    %c0_64 = arith.constant 0 : index
    %163 = vector.load %arg14[%c0_62, %c0_63, %c0_64] : memref<2x8x32xf32, #tpu.memory_space<vmem>>, vector<2x8x32xf32>
    tpu.vector_store %arg14[%c0_62, %c0_63, %c0_64], %162 {strides = array<i32>} : memref<2x8x32xf32, #tpu.memory_space<vmem>>, vector<2x8x32xf32>,
    return
  }
  func.func @transform_0(%arg0: i32) -> (i32, i32, i32) {
    %c0_i32 = arith.constant 0 : i32
    %c0_i32_0 = arith.constant 0 : i32
    %c0_i32_1 = arith.constant 0 : i32
    %c0_i32_2 = arith.constant 0 : i32
    return %c0_i32, %c0_i32_0, %c0_i32_1 : i32, i32, i32
  }
  func.func @transform_1(%arg0: i32) -> (i32, i32, i32) {
    %c0_i32 = arith.constant 0 : i32
    %c0_i32_0 = arith.constant 0 : i32
    %c0_i32_1 = arith.constant 0 : i32
    %c0_i32_2 = arith.constant 0 : i32
    return %c0_i32, %c0_i32_0, %c0_i32_1 : i32, i32, i32
  }
  func.func @transform_2(%arg0: i32) -> (i32, i32) {
    %c0_i32 = arith.constant 0 : i32
    %c0_i32_0 = arith.constant 0 : i32
    %c0_i32_1 = arith.constant 0 : i32
    return %c0_i32, %c0_i32_0 : i32, i32
  }
  func.func @transform_3(%arg0: i32) -> (i32, i32, i32) {
    %c0_i32 = arith.constant 0 : i32
    %c0_i32_0 = arith.constant 0 : i32
    %c0_i32_1 = arith.constant 0 : i32
    %c0_i32_2 = arith.constant 0 : i32
    return %c0_i32, %c0_i32_0, %c0_i32_1 : i32, i32, i32
  }
  func.func @transform_4(%arg0: i32) -> (i32, i32) {
    %c0_i32 = arith.constant 0 : i32
    %c0_i32_0 = arith.constant 0 : i32
    %c0_i32_1 = arith.constant 0 : i32
    return %c0_i32, %c0_i32_0 : i32, i32
  }
  func.func @transform_5(%arg0: i32) -> (i32, i32) {
    %c0_i32 = arith.constant 0 : i32
    %c0_i32_0 = arith.constant 0 : i32
    %c0_i32_1 = arith.constant 0 : i32
    return %c0_i32, %c0_i32_0 : i32, i32
  }
  func.func @transform_6(%arg0: i32) -> (i32, i32) {
    %c0_i32 = arith.constant 0 : i32
    %c0_i32_0 = arith.constant 0 : i32
    %c0_i32_1 = arith.constant 0 : i32
    return %c0_i32, %c0_i32_0 : i32, i32
  }
  func.func @transform_7(%arg0: i32) -> (i32, i32) {
    %c0_i32 = arith.constant 0 : i32
    %c0_i32_0 = arith.constant 0 : i32
    %c0_i32_1 = arith.constant 0 : i32
    return %c0_i32, %c0_i32_0 : i32, i32
  }
  func.func @transform_8(%arg0: i32) -> (i32, i32) {
    %c0_i32 = arith.constant 0 : i32
    %c0_i32_0 = arith.constant 0 : i32
    %c0_i32_1 = arith.constant 0 : i32
    return %c0_i32, %c0_i32_0 : i32, i32
  }
  func.func @transform_9(%arg0: i32) -> (i32, i32) {
    %c0_i32 = arith.constant 0 : i32
    %c0_i32_0 = arith.constant 0 : i32
    %c0_i32_1 = arith.constant 0 : i32
    return %c0_i32, %c0_i32_0 : i32, i32
  }
  func.func @transform_10(%arg0: i32) -> (i32, i32) {
    %c0_i32 = arith.constant 0 : i32
    %c0_i32_0 = arith.constant 0 : i32
    %c0_i32_1 = arith.constant 0 : i32
    return %c0_i32, %c0_i32_0 : i32, i32
  }
  func.func @transform_11(%arg0: i32) -> (i32, i32) {
    %c0_i32 = arith.constant 0 : i32
    %c0_i32_0 = arith.constant 0 : i32
    %c0_i32_1 = arith.constant 0 : i32
    return %c0_i32, %c0_i32_0 : i32, i32
  }
  func.func @transform_12(%arg0: i32) -> (i32, i32) {
    %c0_i32 = arith.constant 0 : i32
    %c0_i32_0 = arith.constant 0 : i32
    %c0_i32_1 = arith.constant 0 : i32
    return %c0_i32, %c0_i32_0 : i32, i32
  }
  func.func @transform_13(%arg0: i32) -> (i32, i32, i32) {
    %c0_i32 = arith.constant 0 : i32
    %c0_i32_0 = arith.constant 0 : i32
    %c0_i32_1 = arith.constant 0 : i32
    %c0_i32_2 = arith.constant 0 : i32
    return %c0_i32, %c0_i32_0, %c0_i32_1 : i32, i32, i32
  }
}

</mosaic_0001>

<bundles_post_ra>
// kernel: tpu_custom_call.1
= control target key start
LH: loop header
LB: loop body
LE: loop exit
PB: predicated region body
PF: predicated region fallthrough
CT: control target
= control target key end

     0   :  { %18 = vsyncpa [#allocation3], 0  ;;  %s2493_s0 = inlined_call_operand.hbm [shape: f32[2,8,96], index: 0, kind: input, shape index: {}]   ;;  %s2494_s1 = inlined_call_operand.hbm [shape: f32[2,8,8], index: 1, kind: input, shape index: {}]   ;;  %s2495_s2 = inlined_call_operand.vmem [shape: bf16[96,96], index: 2, kind: input, shape index: {}]   ;;  %s2496_s3 = inlined_call_operand.hbm [shape: bf16[4,8,32], index: 3, kind: input, shape index: {}]   ;;  %s2497_s4 = inlined_call_operand.vmem [shape: f32[1,32], index: 4, kind: input, shape index: {}]   ;;  %s2498_s5 = inlined_call_operand.vmem [shape: f32[1,32], index: 5, kind: input, shape index: {}]   ;;  %s2499_s6 = inlined_call_operand.vmem [shape: f32[1,32], index: 6, kind: input, shape index: {}]   ;;  %s2500_s7 = inlined_call_operand.hbm [shape: bf16[32,64], index: 7, kind: input, shape index: {}]   ;;  %s2501_s8 = inlined_call_operand.vmem [shape: f32[1,64], index: 8, kind: input, shape index: {}]   ;;  %s2502_s9 = inlined_call_operand.vmem [shape: bf16[64,32], index: 9, kind: input, shape index: {}]   ;;  %s2503_s10 = inlined_call_operand.vmem [shape: f32[1,32], index: 10, kind: input, shape index: {}]   ;;  %s2504_s11 = inlined_call_operand.vmem [shape: f32[1,32], index: 11, kind: input, shape index: {}]   ;;  %s2505_s12 = inlined_call_operand.vmem [shape: f32[1,32], index: 12, kind: input, shape index: {}]   ;;  %s2506_s13 = inlined_call_operand.hbm [shape: f32[2,8,32], index: 13, kind: output, shape index: {}]  }
   0x1   :  { %19 = vsyncpa [#allocation6], 0 }
   0x2   :  { %20 = vsyncpa [#allocation9], 0 }
   0x3   :  { %21 = vsyncpa [#allocation4], 0  ;;  %s2043_s25 = smov [#allocation5]   ;;  %s2044_s27 = smov [#allocation2]  }
   0x4   :  { %s39_s26 = sshll.u32 %s2043_s25, 4  ;;  %s27_s28 = sshll.u32 %s2044_s27, 4  ;;  %s40_s26 = int_to_ptr.vmem [resolvable:$true] %s39_s26  ;;  %s2134_s28 = int_to_ptr.vmem [resolvable:$true] %s27_s28 }
   0x5   :  { %s1925_s14 = scalar_lea.hbm %s2494_s1, 256 }
   0x6   :  { %p1926_p0 = scmp.ne.s32.totalorder %s2494_s1, %s1925_s14  ;;  %p1929_p1 = scmp.lt.u32.totalorder %s1925_s14, %s2494_s1 }
   0x8   :  { %p1931_p2 = pnand %p1929_p1, %p1926_p0 }
   0xa   :  { %1934 = shalt.err (!%p1931_p2)
}
   0xb   :  { %s1935_s19 = scalar_lea.vmem %s40_s26, 256  ;;  %p1940_p4 = scmp.lt.s32.totalorder %s40_s26, %s40_s26 }
   0xc   :  { %p1936_p3 = scmp.ne.s32.totalorder %s40_s26, %s1935_s19  ;;  %p1941_p5 = scmp.lt.s32.totalorder %s1935_s19, %s1935_s19 }
   0xe   :  { %p1942_p6 = por %p1941_p5, %p1940_p4 }
  0x10   :  { %p1943_p7 = pnand %p1942_p6, %p1936_p3 }
  0x12   :  { %1946 = shalt.err (!%p1943_p7)
}
  0x13   :  { %s2045_s20 = smov 128   ;;  %s2046_s21 = smov 8  }
  0x14   :  { %45 = dma.hbm_to_vmem [thread:$0]  %s2494_s1, 256, %s40_s26, [#allocation6], %s2045_s20, %s2045_s20, %s2046_s21  }
  0x15   :  { %s1947_s27 = scalar_lea.hbm %s2493_s0, 256 }
  0x16   :  { %p1948_p8 = scmp.ne.s32.totalorder %s2493_s0, %s1947_s27  ;;  %p1951_p9 = scmp.lt.u32.totalorder %s1947_s27, %s2493_s0 }
  0x18   :  { %p1953_p10 = pnand %p1951_p9, %p1948_p8 }
  0x1a   :  { %1956 = shalt.err (!%p1953_p10)
}
  0x1b   :  { %s1957_s16 = scalar_lea.vmem %s2134_s28, 256  ;;  %p1962_p12 = scmp.lt.s32.totalorder %s2134_s28, %s2134_s28 }
  0x1c   :  { %p1958_p11 = scmp.ne.s32.totalorder %s2134_s28, %s1957_s16  ;;  %p1963_p13 = scmp.lt.s32.totalorder %s1957_s16, %s1957_s16 }
  0x1e   :  { %p1964_p0 = por %p1963_p13, %p1962_p12 }
  0x20   :  { %p1965_p1 = pnand %p1964_p0, %p1958_p11 }
  0x22   :  { %1968 = shalt.err (!%p1965_p1)
}
  0x23   :  { %33 = dma.hbm_to_vmem [thread:$0]  %s2493_s0, 256, %s2134_s28, [#allocation3], %s2045_s20, %s2045_s20, %s2046_s21  }
  0x24   :  { %s2047_s17 = smov [#allocation7]   ;;  %s1969_s23 = scalar_lea.hbm %s2496_s3, 256 }
  0x25   :  { %s53_s18 = sshll.u32 %s2047_s17, 4  ;;  %p1970_p2 = scmp.ne.s32.totalorder %s2496_s3, %s1969_s23  ;;  %s54_s18 = int_to_ptr.vmem [resolvable:$true] %s53_s18 }
  0x26   :  { %p1973_p3 = scmp.lt.u32.totalorder %s1969_s23, %s2496_s3 }
  0x28   :  { %p1975_p4 = pnand %p1973_p3, %p1970_p2 }
  0x2a   :  { %1978 = shalt.err (!%p1975_p4)
}
  0x2b   :  { %s1979_s30 = scalar_lea.vmem %s54_s18, 256  ;;  %p1984_p6 = scmp.lt.s32.totalorder %s54_s18, %s54_s18 }
  0x2c   :  { %p1980_p5 = scmp.ne.s32.totalorder %s54_s18, %s1979_s30  ;;  %p1985_p7 = scmp.lt.s32.totalorder %s1979_s30, %s1979_s30 }
  0x2e   :  { %p1986_p8 = por %p1985_p7, %p1984_p6 }
  0x30   :  { %p1987_p9 = pnand %p1986_p8, %p1980_p5 }
  0x32   :  { %1990 = shalt.err (!%p1987_p9)
}
  0x33   :  { %s2048_s0 = smov 64   ;;  %s2049_s28 = smov 4  }
  0x34   :  { %59 = dma.hbm_to_vmem [thread:$0]  %s2496_s3, 256, %s54_s18, [#allocation6], %s2048_s0, %s2048_s0, %s2049_s28  }
  0x35   :  { %s2050_s16 = smov [#allocation8]   ;;  %s1991_s19 = scalar_lea.hbm %s2500_s7, 256 }
  0x36   :  { %s71_s1 = sshll.u32 %s2050_s16, 4  ;;  %p1992_p10 = scmp.ne.s32.totalorder %s2500_s7, %s1991_s19  ;;  %s72_s1 = int_to_ptr.vmem [resolvable:$true] %s71_s1 }
  0x37   :  { %p1995_p11 = scmp.lt.u32.totalorder %s1991_s19, %s2500_s7 }
  0x39   :  { %p1997_p12 = pnand %p1995_p11, %p1992_p10 }
  0x3b   :  { %2000 = shalt.err (!%p1997_p12)
}
  0x3c   :  { %s2001_s27 = scalar_lea.vmem %s72_s1, 256  ;;  %p2006_p0 = scmp.lt.s32.totalorder %s72_s1, %s72_s1 }
  0x3d   :  { %p2002_p13 = scmp.ne.s32.totalorder %s72_s1, %s2001_s27  ;;  %p2007_p1 = scmp.lt.s32.totalorder %s2001_s27, %s2001_s27 }
  0x3f   :  { %p2008_p2 = por %p2007_p1, %p2006_p0 }
  0x41   :  { %p2009_p3 = pnand %p2008_p2, %p2002_p13 }
  0x43   :  { %2012 = shalt.err (!%p2009_p3)
}
  0x44   :  { %77 = dma.hbm_to_vmem [thread:$0]  %s2500_s7, 256, %s72_s1, [#allocation9], %s2048_s0, %s2048_s0, %s2049_s28  }
  0x45   :  { %2035 = dma.done.wait [#allocation3], 256  }
  0x46   :  { %2036 = vsyncadd [#allocation3], 4294967040 }
  0x47   :  { %2037 = dma.done.wait [#allocation6], 512  }
  0x48   :  { %2038 = vsyncadd [#allocation6], 4294966784 }
  0x49   :  { %2039 = dma.done.wait [#allocation9], 256  }
  0x4a   :  { %2040 = vsyncadd [#allocation9], 4294967040  ;;  %v2051_v0 = vmov 0.0   ;;  %vm2052_vm0 = vmmov 0   ;;  %v1873_v1 = vld [vmem:[%s2495_s2] sm:$0xff]   ;;  %v1874_v2 = vld [vmem:[%s2495_s2 + $0x8] sm:$0xff]  }
  0x4b   :  { %1696 = vmatprep.subr.bf16.mxu0 %v2051_v0  ;;  %1708 = vmatprep.mubr.msk.bf16.mxu0 %vm2052_vm0, %v2051_v0  ;;  %v1875_v3 = vld [vmem:[%s2495_s2 + $0x10] sm:$0xff]   ;;  %v1876_v4 = vld [vmem:[%s2495_s2 + $0x18] sm:$0xff]   ;;  %v1877_v5 = vld [vmem:[%s2495_s2 + $0x20] sm:$0xff]   ;;  %vm152_vm1 = vcmask 785408   ;;  %s2054_s23 = smov 88   ;;  %s2055_s24 = smov 56  }
  0x4c   :  { %1712 = vmatprep.subr.bf16.mxu1 %v2051_v0  ;;  %1714 = vmatprep.mubr.msk.bf16.mxu1 %vm2052_vm0, %v2051_v0  ;;  %v1878_v6 = vld [vmem:[%s2495_s2 + $0x28] sm:$0xff]   ;;  %v2227_v7 = vld [vmem:[#allocation2] sm:$0xff]  ;;  %s2053_s2 = smov 96   ;;  %s2056_s25 = smov 80   ;;  %vm206_vm2 = vcmask 64512   ;;  %v2285_v34 = vld [vmem:[#allocation5] sm:$0xff] }
  0x4d   :  { %1697 = vmatpush3.bf16.msra.mxu0 %v1873_v1  ;;  %v2229_v8 = vld [vmem:[#allocation2 + $0x8] sm:$0xff]  ;;  %s2057_s27 = smov 48   ;;  %vm606_vm3 = vcmp.lt.f32.partialorder %v2285_v34, 0.0  ;;  %v2292_v41 = vld [vmem:[#allocation5 + $0x8] sm:$0xff]  ;;  %s2058_s3 = smov 72   ;;  %vm719_vm5 = vcmask 1043456  }
  0x4e   :  { %1698 = vmatprep.subr.bf16.mxu0 %v2051_v0  ;;  %v103_v9 = vpack.c.bf16 %v2229_v8, %v2227_v7  ;;  %vm607_vm4 = vcmp.lt.f32.partialorder %v2292_v41, 0.0  ;;  %s2059_s18 = smov 40   ;;  %s2060_s29 = smov 120   ;;  %vm1321_vm6 = vcmask 261120   ;;  %vm1479_vm7 = vcmask 523264  }
  0x4f   :  { %s2061_s7 = smov 112   ;;  %s2062_s30 = smov 104  }
  0x51   :  { %1699 = vmatpush3.bf16.msra.mxu0 %v1874_v2 }
  0x52   :  { %1700 = vmatprep.subr.bf16.mxu0 %v2051_v0 }
  0x55   :  { %1701 = vmatpush3.bf16.msra.mxu0 %v1875_v3 }
  0x56   :  { %1702 = vmatprep.subr.bf16.mxu0 %v2051_v0 }
  0x59   :  { %1703 = vmatpush3.bf16.msra.mxu0 %v1876_v4 }
  0x5a   :  { %1704 = vmatprep.subr.bf16.mxu0 %v2051_v0 }
  0x5d   :  { %1705 = vmatpush3.bf16.msra.mxu0 %v1877_v5 }
  0x5e   :  { %1706 = vmatprep.subr.bf16.mxu0 %v2051_v0 }
  0x61   :  { %1707 = vmatpush3.bf16.msra.mxu0 %v1878_v6 }
  0x62   :  { %1742 = vmatprep.subr.bf16.mxu0 %v2051_v0 }
  0x64   :  { %1709 = vmatmul.mubr.msk.bf16.vlgmr.msra.gmra.mrb[0].mxu0 %vm152_vm1, %v103_v9 }
  0x65   :  { %1744 = vmatprep.mubr.msk.bf16.mxu0 %vm2052_vm0, %v2051_v0 }
 0x137   :  { %v190_v10 = vpop.f32.mrb[0].mxu0 }
 0x138   :  { %v2237_v11 = vpack.c.bf16 %v190_v10, %v190_v10  ;;  %v1710_v12 = vpop.f32.mrb[1].mxu0 }
 0x139   :  { %v193_v13 = vpop.f32.mrb[2].mxu0 }
 0x13a   :  { %v2239_v14 = vpack.c.bf16 %v193_v13, %v193_v13  ;;  %204 = vrot.lane.b32.xlu0 %v2237_v11, %s2053_s2  ;;  %v1711_v15 = vpop.f32.mrb[3].mxu0 }
 0x13c   :  { %256 = vrot.lane.b32.xlu1 %v2239_v14, %s2053_s2 }
 0x13e   :  { %202 = vrot.lane.b32.xlu0 %v2237_v11, %s2048_s0 }
 0x140   :  { %254 = vrot.lane.b32.xlu1 %v2239_v14, %s2048_s0 }
 0x142   :  { %306 = vrot.lane.b32.xlu0 %v2237_v11, %s2054_s23 }
 0x144   :  { %304 = vrot.lane.b32.xlu1 %v2237_v11, %s2055_s24 }
 0x146   :  { %356 = vrot.lane.b32.xlu0 %v2239_v14, %s2054_s23 }
 0x148   :  { %354 = vrot.lane.b32.xlu1 %v2239_v14, %s2055_s24 }
 0x14a   :  { %406 = vrot.lane.b32.xlu0 %v2237_v11, %s2056_s25 }
 0x14c   :  { %456 = vrot.lane.b32.xlu1 %v2239_v14, %s2056_s25 }
 0x14e   :  { %404 = vrot.lane.b32.xlu0 %v2237_v11, %s2057_s27 }
 0x150   :  { %454 = vrot.lane.b32.xlu1 %v2239_v14, %s2057_s27 }
 0x1ac   :  { %v205_v16 = vpop.permute.xlu0 %204 }
 0x1ad   :  { %v211_v17 = vsel %vm206_vm2, %v205_v16, 0 }
 0x1ae   :  { %1713 = vmatpush3.bf16.xpose.msra.mxu1 %v211_v17  ;;  %v257_v18 = vpop.permute.xlu1 %256 }
 0x1af   :  { %1718 = vmatprep.subr.bf16.mxu1 %v2051_v0  ;;  %v262_v21 = vsel %vm206_vm2, %v257_v18, 0 }
 0x1b0   :  { %v203_v20 = vpop.permute.xlu0 %202 }
 0x1b2   :  { %v255_v19 = vpop.permute.xlu1 %254 }
 0x1b4   :  { %v307_v23 = vpop.permute.xlu0 %306 }
 0x1b5   :  { %1715 = vmatmul.mubr.msk.bf16.vlgmr.msra.gmra.mrb[0].mxu1 %vm206_vm2, %v203_v20  ;;  %v312_v25 = vsel %vm206_vm2, %v307_v23, 0  ;;  %v721_v23 = vsel %vm719_vm5, %v2237_v11, 0 }
 0x1b6   :  { %1719 = vmatpush3.bf16.xpose.msra.mxu1 %v262_v21  ;;  %v305_v22 = vpop.permute.xlu1 %304  ;;  %1720 = vmatprep.mubr.msk.bf16.mxu1 %vm2052_vm0, %v2051_v0 }
 0x1b7   :  { %1724 = vmatprep.subr.bf16.mxu1 %v2051_v0 }
 0x1b8   :  { %v357_v28 = vpop.permute.xlu0 %356 }
 0x1b9   :  { %v362_v29 = vsel %vm206_vm2, %v357_v28, 0 }
 0x1ba   :  { %v355_v24 = vpop.permute.xlu1 %354 }
 0x1bc   :  { %v407_v31 = vpop.permute.xlu0 %406 }
 0x1bd   :  { %1721 = vmatmul.mubr.msk.bf16.vlgmr.msra.gmra.mrb[4].mxu1 %vm206_vm2, %v255_v19  ;;  %v412_v32 = vsel %vm206_vm2, %v407_v31, 0 }
 0x1be   :  { %1725 = vmatpush3.bf16.xpose.msra.mxu1 %v312_v25  ;;  %v457_v26 = vpop.permute.xlu1 %456  ;;  %1726 = vmatprep.mubr.msk.bf16.mxu1 %vm2052_vm0, %v2051_v0 }
 0x1bf   :  { %v462_v27 = vsel %vm206_vm2, %v457_v26, 0  ;;  %1730 = vmatprep.subr.bf16.mxu1 %v2051_v0 }
 0x1c0   :  { %1743 = vmatpush3.bf16.xpose.msra.mxu0 %v462_v27  ;;  %v405_v33 = vpop.permute.xlu0 %404 }
 0x1c1   :  { %1754 = vmatprep.subr.bf16.mxu0 %v2051_v0 }
 0x1c2   :  { %v455_v30 = vpop.permute.xlu1 %454 }
 0x1c5   :  { %1727 = vmatmul.mubr.msk.bf16.vlgmr.msra.gmra.mrb[8].mxu1 %vm206_vm2, %v305_v22 }
 0x1c6   :  { %1731 = vmatpush3.bf16.xpose.msra.mxu1 %v362_v29  ;;  %1732 = vmatprep.mubr.msk.bf16.mxu1 %vm2052_vm0, %v2051_v0 }
 0x1c7   :  { %1745 = vmatmul.mubr.msk.bf16.vlgmr.msra.gmra.mrb[4].mxu0 %vm206_vm2, %v455_v30  ;;  %1736 = vmatprep.subr.bf16.mxu1 %v2051_v0 }
 0x1c8   :  { %1756 = vmatprep.mubr.msk.bf16.mxu0 %vm2052_vm0, %v2051_v0 }
 0x1cd   :  { %1733 = vmatmul.mubr.msk.bf16.vlgmr.msra.gmra.mrb[12].mxu1 %vm206_vm2, %v355_v24 }
 0x1ce   :  { %1737 = vmatpush3.bf16.xpose.msra.mxu1 %v412_v32  ;;  %1738 = vmatprep.mubr.msk.bf16.mxu1 %vm2052_vm0, %v2051_v0 }
 0x1cf   :  { %1748 = vmatprep.subr.bf16.mxu1 %v2051_v0 }
 0x1d5   :  { %1739 = vmatmul.mubr.msk.bf16.vlgmr.msra.gmra.mrb[16].mxu1 %vm206_vm2, %v405_v33 }
 0x1d6   :  { %1750 = vmatprep.mubr.msk.bf16.mxu1 %vm2052_vm0, %v2051_v0 }
 0x288   :  { %v247_v35 = vpop.f32.mrb[0].mxu1 }
 0x289   :  { %v1716_v36 = vpop.f32.mrb[1].mxu1  ;;  %v612_v37 = vsel %vm606_vm3, %v2285_v34, %v247_v35  ;;  %v767_v35 = vsel %vm719_vm5, %v2239_v14, 0 }
 0x28a   :  { %v250_v38 = vpop.f32.mrb[2].mxu1  ;;  %v620_v39 = vsel %vm206_vm2, %v612_v37, -inf }
 0x28b   :  { %v1717_v40 = vpop.f32.mrb[3].mxu1  ;;  %621 = vmax.xlane.f32.xlu0 %v620_v39 }
 0x290   :  { %v298_v42 = vpop.f32.mrb[4].mxu1 }
 0x291   :  { %v1722_v43 = vpop.f32.mrb[5].mxu1  ;;  %v613_v44 = vsel %vm607_vm4, %v2292_v41, %v298_v42 }
 0x292   :  { %v301_v45 = vpop.f32.mrb[6].mxu1  ;;  %v623_v46 = vsel %vm206_vm2, %v613_v44, -inf }
 0x293   :  { %624 = vmax.xlane.f32.xlu1 %v623_v46  ;;  %v1723_v47 = vpop.f32.mrb[7].mxu1 }
 0x298   :  { %v348_v48 = vpop.f32.mrb[8].mxu1 }
 0x299   :  { %v1728_v49 = vpop.f32.mrb[9].mxu1  ;;  %v614_v50 = vsel %vm606_vm3, %v2285_v34, %v348_v48 }
 0x29a   :  { %v351_v51 = vpop.f32.mrb[10].mxu1  ;;  %v2302_v52 = vpop.f32.mrb[4].mxu0  ;;  %v626_v53 = vsel %vm206_vm2, %v614_v50, -inf }
 0x29b   :  { %627 = vmax.xlane.f32.xlu0 %v626_v53  ;;  %v1729_v54 = vpop.f32.mrb[11].mxu1  ;;  %v1746_v55 = vpop.f32.mrb[5].mxu0  ;;  %v617_v38 = vsel %vm607_vm4, %v2292_v41, %v2302_v52 }
 0x29c   :  { %v501_v56 = vpop.f32.mrb[6].mxu0  ;;  %v635_v39 = vsel %vm206_vm2, %v617_v38, -inf }
 0x29d   :  { %v1747_v57 = vpop.f32.mrb[7].mxu0 }
 0x2a0   :  { %v398_v58 = vpop.f32.mrb[12].mxu1 }
 0x2a1   :  { %v1734_v59 = vpop.f32.mrb[13].mxu1  ;;  %v615_v60 = vsel %vm607_vm4, %v2292_v41, %v398_v58 }
 0x2a2   :  { %v401_v61 = vpop.f32.mrb[14].mxu1  ;;  %v629_v62 = vsel %vm206_vm2, %v615_v60, -inf }
 0x2a3   :  { %630 = vmax.xlane.f32.xlu0 %v629_v62  ;;  %v1735_v63 = vpop.f32.mrb[15].mxu1 }
 0x2a4   :  { %506 = vrot.lane.b32.xlu1 %v2237_v11, %s2058_s3 }
 0x2a8   :  { %504 = vrot.lane.b32.xlu1 %v2237_v11, %s2059_s18  ;;  %v448_v1 = vpop.f32.mrb[16].mxu1 }
 0x2a9   :  { %v1740_v2 = vpop.f32.mrb[17].mxu1  ;;  %v616_v40 = vsel %vm606_vm3, %v2285_v34, %v448_v1 }
 0x2aa   :  { %v451_v3 = vpop.f32.mrb[18].mxu1  ;;  %v632_v42 = vsel %vm206_vm2, %v616_v40, -inf }
 0x2ab   :  { %v1741_v4 = vpop.f32.mrb[19].mxu1 }
 0x2ac   :  { %554 = vrot.lane.b32.xlu1 %v2239_v14, %s2059_s18  ;;  %s2063_s18 = smov [#allocation10]  }
 0x2b9   :  { %556 = vrot.lane.b32.xlu0 %v2239_v14, %s2058_s3 }
 0x318   :  { %v622_v5 = vpop.xlane.xlu0 %621 }
 0x319   :  { %v644_v6 = vsub.f32 %v612_v37, %v622_v5 }
 0x31b   :  { %v652_v9 = vmul.f32 1.442695, %v644_v6 }
 0x31d   :  { %1885 = vpow2.f32 %v652_v9 }
 0x320   :  { %v625_v10 = vpop.xlane.xlu1 %624 }
 0x321   :  { %v645_v12 = vsub.f32 %v613_v44, %v625_v10 }
 0x323   :  { %v654_v13 = vmul.f32 1.442695, %v645_v12 }
 0x324   :  { %v507_v15 = vpop.permute.xlu1 %506 }
 0x325   :  { %1887 = vpow2.f32 %v654_v13  ;;  %v512_v16 = vsel %vm206_vm2, %v507_v15, 0 }
 0x326   :  { %1749 = vmatpush3.bf16.xpose.msra.mxu1 %v512_v16 }
 0x327   :  { %v1886_v17 = vpop.eup %1885  ;;  %1760 = vmatprep.subr.bf16.mxu1 %v2051_v0 }
 0x328   :  { %v628_v18 = vpop.xlane.xlu0 %627  ;;  %v668_v19 = vsel %vm206_vm2, %v1886_v17, 0.0  ;;  %v505_v22 = vpop.permute.xlu1 %504 }
 0x329   :  { %v646_v20 = vsub.f32 %v614_v50, %v628_v18  ;;  %669 = vadd.xlane.f32.xlu1 %v668_v19 }
 0x32b   :  { %v656_v21 = vmul.f32 1.442695, %v646_v20 }
 0x32c   :  { %v555_v33 = vpop.permute.xlu1 %554 }
 0x32d   :  { %1889 = vpow2.f32 %v656_v21  ;;  %1751 = vmatmul.mubr.msk.bf16.vlgmr.msra.gmra.mrb[20].mxu1 %vm206_vm2, %v505_v22 }
 0x32e   :  { %1761 = vmatpush3.bf16.msra.mxu1 %v721_v23  ;;  %1762 = vmatprep.mubr.msk.bf16.mxu1 %vm2052_vm0, %v2051_v0  ;;  %v810_v23 = vld [vmem:[#allocation7] sm:$0xf] }
 0x32f   :  { %v1888_v24 = vpop.eup %1887  ;;  %1772 = vmatprep.subr.bf16.mxu1 %v2051_v0 }
 0x330   :  { %v631_v25 = vpop.xlane.xlu0 %630  ;;  %v671_v26 = vsel %vm206_vm2, %v1888_v24, 0.0 }
 0x331   :  { %v647_v27 = vsub.f32 %v615_v60, %v631_v25  ;;  %672 = vadd.xlane.f32.xlu0 %v671_v26  ;;  %v909_v25 = vld [vmem:[#allocation7 + $0x4] sm:$0xf] }
 0x332   :  { %v914_v26 = vsel %vm719_vm5, %v909_v25, 0 }
 0x333   :  { %v658_v28 = vmul.f32 1.442695, %v647_v27 }
 0x334   :  { %v557_v29 = vpop.permute.xlu0 %556 }
 0x335   :  { %1891 = vpow2.f32 %v658_v28  ;;  %v562_v30 = vsel %vm206_vm2, %v557_v29, 0 }
 0x336   :  { %1755 = vmatpush3.bf16.xpose.msra.mxu0 %v562_v30 }
 0x337   :  { %v1890_v31 = vpop.eup %1889  ;;  %1766 = vmatprep.subr.bf16.mxu0 %v2051_v0 }
 0x338   :  { %v674_v32 = vsel %vm206_vm2, %v1890_v31, 0.0 }
 0x339   :  { %675 = vadd.xlane.f32.xlu1 %v674_v32 }
 0x33d   :  { %1757 = vmatmul.mubr.msk.bf16.vlgmr.msra.gmra.mrb[8].mxu0 %vm206_vm2, %v555_v33 }
 0x33e   :  { %1767 = vmatpush3.bf16.msra.mxu0 %v767_v35  ;;  %1768 = vmatprep.mubr.msk.bf16.mxu0 %vm2052_vm0, %v2051_v0 }
 0x33f   :  { %v1892_v36 = vpop.eup %1891  ;;  %1778 = vmatprep.subr.bf16.mxu0 %v2051_v0 }
 0x340   :  { %v677_v37 = vsel %vm206_vm2, %v1892_v36, 0.0 }
 0x341   :  { %678 = vadd.xlane.f32.xlu0 %v677_v37 }
 0x34a   :  { %859 = vrot.lane.b32.xlu1 %v2239_v14, %s2060_s29 }
 0x357   :  { %811 = vrot.lane.b32.xlu0 %v2237_v11, %s2060_s29  ;;  %s1581_s29 = sshll.u32 %s2063_s18, 4  ;;  %s1582_s29 = int_to_ptr.vmem [resolvable:$true] %s1581_s29 }
 0x358   :  { %p2018_p5 = scmp.lt.s32.totalorder %s1582_s29, %s1582_s29 }
 0x36e   :  { %636 = vmax.xlane.f32.xlu1 %v635_v39 }
 0x376   :  { %633 = vmax.xlane.f32.xlu0 %v632_v42 }
 0x37f   :  { %1004 = vrot.lane.b32.xlu1 %v2237_v11, %s2061_s7 }
 0x3b6   :  { %v670_v43 = vpop.xlane.xlu1 %669 }
 0x3b7   :  { %1893 = vrcp.f32 %v670_v43 }
 0x3be   :  { %v673_v44 = vpop.xlane.xlu0 %672 }
 0x3bf   :  { %1895 = vrcp.f32 %v673_v44 }
 0x3c1   :  { %v1894_v45 = vpop.eup %1893 }
 0x3c2   :  { %v700_v46 = vmul.f32 %v1894_v45, %v1886_v17 }
 0x3c4   :  { %v708_v47 = vpack.c.bf16 %v700_v46, %v700_v46 }
 0x3c6   :  { %1763 = vmatmul.mubr.msk.bf16.vlgmr.msra.gmra.mrb[24].mxu1 %vm206_vm2, %v708_v47  ;;  %v676_v48 = vpop.xlane.xlu1 %675 }
 0x3c7   :  { %1897 = vrcp.f32 %v676_v48  ;;  %1774 = vmatprep.mubr.msk.bf16.mxu1 %vm2052_vm0, %v2051_v0 }
 0x3c9   :  { %v1896_v49 = vpop.eup %1895 }
 0x3ca   :  { %v701_v50 = vmul.f32 %v1896_v49, %v1888_v24  ;;  %v860_v51 = vpop.permute.xlu1 %859  ;;  %v961_v24 = vsel %vm719_vm5, %v810_v23, 0 }
 0x3cb   :  { %v865_v53 = vsel %vm719_vm5, %v860_v51, 0 }
 0x3cc   :  { %v709_v52 = vpack.c.bf16 %v701_v50, %v701_v50 }
 0x3ce   :  { %v679_v54 = vpop.xlane.xlu0 %678  ;;  %1769 = vmatmul.mubr.msk.bf16.vlgmr.msra.gmra.mrb[12].mxu0 %vm206_vm2, %v709_v52 }
 0x3cf   :  { %1899 = vrcp.f32 %v679_v54  ;;  %1779 = vmatpush3.bf16.msra.mxu0 %v865_v53  ;;  %1780 = vmatprep.mubr.msk.bf16.mxu0 %vm2052_vm0, %v2051_v0 }
 0x3d0   :  { %1790 = vmatprep.subr.bf16.mxu0 %v2051_v0 }
 0x3d1   :  { %v1898_v55 = vpop.eup %1897 }
 0x3d2   :  { %v702_v56 = vmul.f32 %v1898_v55, %v1890_v31  ;;  %v812_v57 = vpop.permute.xlu0 %811 }
 0x3d3   :  { %v817_v58 = vsel %vm719_vm5, %v812_v57, 0 }
 0x3d4   :  { %1773 = vmatpush3.bf16.msra.mxu1 %v817_v58  ;;  %v710_v59 = vpack.c.bf16 %v702_v56, %v702_v56 }
 0x3d5   :  { %1784 = vmatprep.subr.bf16.mxu1 %v2051_v0 }
 0x3d7   :  { %1775 = vmatmul.mubr.msk.bf16.vlgmr.msra.gmra.mrb[28].mxu1 %vm206_vm2, %v710_v59 }
 0x3d8   :  { %1786 = vmatprep.mubr.msk.bf16.mxu1 %vm2052_vm0, %v2051_v0  ;;  %1785 = vmatpush3.bf16.msra.mxu1 %v914_v26 }
 0x3d9   :  { %v1900_v60 = vpop.eup %1899  ;;  %1796 = vmatprep.subr.bf16.mxu1 %v2051_v0 }
 0x3da   :  { %v703_v61 = vmul.f32 %v1900_v60, %v1892_v36 }
 0x3dc   :  { %v711_v62 = vpack.c.bf16 %v703_v61, %v703_v61 }
 0x3de   :  { %1781 = vmatmul.mubr.msk.bf16.vlgmr.msra.gmra.mrb[16].mxu0 %vm206_vm2, %v711_v62 }
 0x3df   :  { %1792 = vmatprep.mubr.msk.bf16.mxu0 %vm2052_vm0, %v2051_v0  ;;  %1791 = vmatpush3.bf16.msra.mxu0 %v961_v24 }
 0x3e0   :  { %1802 = vmatprep.subr.bf16.mxu0 %v2051_v0 }
 0x3fb   :  { %v637_v63 = vpop.xlane.xlu1 %636 }
 0x3fc   :  { %v649_v1 = vsub.f32 %v617_v38, %v637_v63 }
 0x3fe   :  { %v662_v2 = vmul.f32 1.442695, %v649_v1 }
 0x3ff   :  { %v1005_v29 = vpop.permute.xlu1 %1004 }
 0x400   :  { %1901 = vpow2.f32 %v662_v2  ;;  %v548_v3 = vpop.f32.mrb[20].mxu1  ;;  %v1010_v61 = vsel %vm719_vm5, %v1005_v29, 0 }
 0x401   :  { %v1752_v4 = vpop.f32.mrb[21].mxu1  ;;  %v618_v5 = vsel %vm606_vm3, %v2285_v34, %v548_v3 }
 0x402   :  { %v551_v6 = vpop.f32.mrb[22].mxu1  ;;  %v638_v9 = vsel %vm206_vm2, %v618_v5, -inf }
 0x403   :  { %v634_v10 = vpop.xlane.xlu0 %633  ;;  %v1753_v12 = vpop.f32.mrb[23].mxu1  ;;  %639 = vmax.xlane.f32.xlu1 %v638_v9 }
 0x404   :  { %v648_v13 = vsub.f32 %v616_v40, %v634_v10 }
 0x406   :  { %v660_v15 = vmul.f32 1.442695, %v648_v13 }
 0x408   :  { %1903 = vpow2.f32 %v660_v15 }
 0x40a   :  { %v1902_v16 = vpop.eup %1901 }
 0x40b   :  { %v683_v17 = vsel %vm206_vm2, %v1902_v16, 0.0 }
 0x40c   :  { %684 = vadd.xlane.f32.xlu0 %v683_v17 }
 0x410   :  { %v598_v18 = vpop.f32.mrb[8].mxu0 }
 0x411   :  { %v1758_v19 = vpop.f32.mrb[9].mxu0  ;;  %v619_v27 = vsel %vm607_vm4, %v2292_v41, %v598_v18 }
 0x412   :  { %v2367_v20 = vpop.eup %1903  ;;  %v601_v21 = vpop.f32.mrb[10].mxu0  ;;  %v641_v28 = vsel %vm206_vm2, %v619_v27, -inf }
 0x413   :  { %v1759_v22 = vpop.f32.mrb[11].mxu0  ;;  %v680_v34 = vsel %vm206_vm2, %v2367_v20, 0.0 }
 0x414   :  { %681 = vadd.xlane.f32.xlu0 %v680_v34 }
 0x42a   :  { %1052 = vrot.lane.b32.xlu0 %v2239_v14, %s2061_s7 }
 0x449   :  { %642 = vmax.xlane.f32.xlu0 %v641_v28 }
 0x490   :  { %v640_v30 = vpop.xlane.xlu1 %639 }
 0x491   :  { %v650_v31 = vsub.f32 %v618_v5, %v640_v30 }
 0x493   :  { %v664_v32 = vmul.f32 1.442695, %v650_v31 }
 0x495   :  { %1905 = vpow2.f32 %v664_v32 }
 0x499   :  { %v757_v33 = vpop.f32.mrb[24].mxu1  ;;  %v685_v35 = vpop.xlane.xlu0 %684 }
 0x49a   :  { %1907 = vrcp.f32 %v685_v35  ;;  %v1764_v36 = vpop.f32.mrb[25].mxu1 }
 0x49b   :  { %v760_v37 = vpop.f32.mrb[26].mxu1 }
 0x49c   :  { %v1765_v38 = vpop.f32.mrb[27].mxu1 }
 0x49f   :  { %v2381_v39 = vpop.eup %1905 }
 0x4a0   :  { %v686_v40 = vsel %vm206_vm2, %v2381_v39, 0.0 }
 0x4a1   :  { %v682_v41 = vpop.xlane.xlu0 %681  ;;  %687 = vadd.xlane.f32.xlu1 %v686_v40  ;;  %v803_v42 = vpop.f32.mrb[12].mxu0  ;;  %v1250_v40 = vld [vmem:[#allocation7 + $0xc] sm:$0xf] }
 0x4a2   :  { %v809_v43 = vpack.c.bf16 %v803_v42, %v757_v33  ;;  %v1770_v44 = vpop.f32.mrb[13].mxu0  ;;  %1909 = vrcp.f32 %v682_v41  ;;  %v1255_v41 = vsel %vm719_vm5, %v1250_v40, 0 }
 0x4a3   :  { %v806_v45 = vpop.f32.mrb[14].mxu0 }
 0x4a4   :  { %v1908_v46 = vpop.eup %1907  ;;  %v1771_v47 = vpop.f32.mrb[15].mxu0  ;;  %1793 = vmatmul.mubr.msk.bf16.vlgmr.msra.gmra.mrb[20].mxu0 %vm206_vm2, %v809_v43 }
 0x4a5   :  { %v1053_v48 = vpop.permute.xlu0 %1052  ;;  %1804 = vmatprep.mubr.msk.bf16.mxu0 %vm2052_vm0, %v2051_v0  ;;  %v705_v49 = vmul.f32 %v1908_v46, %v1902_v16 }
 0x4a6   :  { %v1058_v50 = vsel %vm719_vm5, %v1053_v48, 0 }
 0x4a7   :  { %1803 = vmatpush3.bf16.msra.mxu0 %v1058_v50  ;;  %v713_v52 = vpack.c.bf16 %v705_v49, %v705_v49 }
 0x4a8   :  { %1814 = vmatprep.subr.bf16.mxu0 %v2051_v0 }
 0x4aa   :  { %v853_v51 = vpop.f32.mrb[28].mxu1 }
 0x4ab   :  { %v1776_v53 = vpop.f32.mrb[29].mxu1 }
 0x4ac   :  { %v856_v54 = vpop.f32.mrb[30].mxu1  ;;  %1805 = vmatmul.mubr.msk.bf16.vlgmr.msra.gmra.mrb[24].mxu0 %vm206_vm2, %v713_v52  ;;  %v1910_v59 = vpop.eup %1909 }
 0x4ad   :  { %v1777_v55 = vpop.f32.mrb[31].mxu1  ;;  %1816 = vmatprep.mubr.msk.bf16.mxu0 %vm2052_vm0, %v2051_v0  ;;  %v704_v63 = vmul.f32 %v1910_v59, %v2367_v20  ;;  %v1624_v59 = vld [vmem:[%s2497_s4] ss:$0 sm:$0xff] }
 0x4b1   :  { %v901_v56 = vpop.f32.mrb[16].mxu0 }
 0x4b2   :  { %v907_v57 = vpack.c.bf16 %v901_v56, %v853_v51  ;;  %1152 = vrot.lane.b32.xlu1 %v2237_v11, %s2062_s30  ;;  %v1782_v58 = vpop.f32.mrb[17].mxu0  ;;  %v712_v11 = vpack.c.bf16 %v704_v63, %v704_v63 }
 0x4b3   :  { %v904_v60 = vpop.f32.mrb[18].mxu0 }
 0x4b4   :  { %v1783_v62 = vpop.f32.mrb[19].mxu0  ;;  %1787 = vmatmul.mubr.msk.bf16.vlgmr.msra.gmra.mrb[32].mxu1 %vm206_vm2, %v907_v57 }
 0x4b5   :  { %1797 = vmatpush3.bf16.msra.mxu1 %v1010_v61  ;;  %1798 = vmatprep.mubr.msk.bf16.mxu1 %vm2052_vm0, %v2051_v0 }
 0x4b6   :  { %1808 = vmatprep.subr.bf16.mxu1 %v2051_v0  ;;  %1311 = vrot.lane.b32.xlu1 %v2227_v7, %s2048_s0  ;;  %v1102_v7 = vld [vmem:[#allocation7 + $0x8] sm:$0xf] }
 0x4b7   :  { %v1107_v6 = vsel %vm719_vm5, %v1102_v7, 0 }
 0x4ba   :  { %1313 = vrot.lane.b32.xlu1 %v2229_v8, %s2048_s0 }
 0x4bc   :  { %1799 = vmatmul.mubr.msk.bf16.vlgmr.msra.gmra.mrb[36].mxu1 %vm206_vm2, %v712_v11 }
 0x4bd   :  { %1810 = vmatprep.mubr.msk.bf16.mxu1 %vm2052_vm0, %v2051_v0  ;;  %1809 = vmatpush3.bf16.msra.mxu1 %v1107_v6 }
 0x4be   :  { %1820 = vmatprep.subr.bf16.mxu1 %v2051_v0 }
 0x4d6   :  { %v643_v1 = vpop.xlane.xlu0 %642 }
 0x4d7   :  { %v651_v2 = vsub.f32 %v619_v27, %v643_v1 }
 0x4d9   :  { %v666_v3 = vmul.f32 1.442695, %v651_v2 }
 0x4db   :  { %1911 = vpow2.f32 %v666_v3 }
 0x4e5   :  { %v1912_v4 = vpop.eup %1911 }
 0x4e6   :  { %v689_v5 = vsel %vm206_vm2, %v1912_v4, 0.0 }
 0x4e7   :  { %690 = vadd.xlane.f32.xlu0 %v689_v5 }
 0x4fd   :  { %1200 = vrot.lane.b32.xlu0 %v2239_v14, %s2062_s30 }
 0x52e   :  { %v688_v8 = vpop.xlane.xlu1 %687 }
 0x52f   :  { %1913 = vrcp.f32 %v688_v8 }
 0x532   :  { %v1153_v9 = vpop.permute.xlu1 %1152 }
 0x533   :  { %v1158_v10 = vsel %vm719_vm5, %v1153_v9, 0 }
 0x534   :  { %1815 = vmatpush3.bf16.msra.mxu0 %v1158_v10 }
 0x535   :  { %1826 = vmatprep.subr.bf16.mxu0 %v2051_v0 }
 0x536   :  { %v1312_v57 = vpop.permute.xlu1 %1311 }
 0x539   :  { %v1914_v12 = vpop.eup %1913 }
 0x53a   :  { %v706_v13 = vmul.f32 %v1914_v12, %v2381_v39  ;;  %v1314_v2 = vpop.permute.xlu1 %1313 }
 0x53c   :  { %v714_v15 = vpack.c.bf16 %v706_v13, %v706_v13  ;;  %v1879_v13 = vld [vmem:[#allocation8] sm:$0xff]  }
 0x53e   :  { %1817 = vmatmul.mubr.msk.bf16.vlgmr.msra.gmra.mrb[28].mxu0 %vm206_vm2, %v714_v15  ;;  %v1880_v15 = vld [vmem:[#allocation8 + $0x8] sm:$0xff]  }
 0x53f   :  { %1828 = vmatprep.mubr.msk.bf16.mxu0 %vm2052_vm0, %v2051_v0  ;;  %1827 = vmatpush3.bf16.msra.mxu0 %v1255_v41 }
 0x540   :  { %1840 = vmatprep.subr.bf16.mxu0 %v2051_v0 }
 0x574   :  { %v691_v34 = vpop.xlane.xlu0 %690 }
 0x575   :  { %1915 = vrcp.f32 %v691_v34 }
 0x577   :  { %v997_v14 = vpop.f32.mrb[20].mxu0 }
 0x578   :  { %v1794_v16 = vpop.f32.mrb[21].mxu0  ;;  %v1201_v29 = vpop.permute.xlu0 %1200 }
 0x579   :  { %v1000_v17 = vpop.f32.mrb[22].mxu0  ;;  %v1206_v36 = vsel %vm719_vm5, %v1201_v29, 0  ;;  %v1882_v16 = vld [vmem:[%s2502_s9 + $0x8] sm:$0xff]  }
 0x57a   :  { %v1795_v18 = vpop.f32.mrb[23].mxu0 }
 0x57f   :  { %v1094_v19 = vpop.f32.mrb[24].mxu0  ;;  %v1916_v33 = vpop.eup %1915 }
 0x580   :  { %v1806_v20 = vpop.f32.mrb[25].mxu0  ;;  %v707_v38 = vmul.f32 %v1916_v33, %v1912_v4  ;;  %v1625_v33 = vld [vmem:[%s2498_s5] ss:$0 sm:$0xff] }
 0x581   :  { %v1097_v21 = vpop.f32.mrb[26].mxu0 }
 0x582   :  { %v1807_v22 = vpop.f32.mrb[27].mxu0  ;;  %v715_v39 = vpack.c.bf16 %v707_v38, %v707_v38 }
 0x587   :  { %v950_v23 = vpop.f32.mrb[32].mxu1 }
 0x588   :  { %v998_v24 = vadd.f32 %v997_v14, %v950_v23  ;;  %v1788_v25 = vpop.f32.mrb[33].mxu1  ;;  %v1881_v14 = vld [vmem:[%s2502_s9] sm:$0xff]  }
 0x589   :  { %v953_v26 = vpop.f32.mrb[34].mxu1 }
 0x58a   :  { %v1001_v27 = vadd.f32 %v1000_v17, %v953_v26  ;;  %v1789_v28 = vpop.f32.mrb[35].mxu1 }
 0x58f   :  { %v1046_v30 = vpop.f32.mrb[36].mxu1 }
 0x590   :  { %v1100_v31 = vpack.c.bf16 %v1094_v19, %v1046_v30  ;;  %v1800_v32 = vpop.f32.mrb[37].mxu1 }
 0x591   :  { %v1049_v35 = vpop.f32.mrb[38].mxu1 }
 0x592   :  { %v1801_v37 = vpop.f32.mrb[39].mxu1  ;;  %1811 = vmatmul.mubr.msk.bf16.vlgmr.msra.gmra.mrb[40].mxu1 %vm206_vm2, %v1100_v31 }
 0x593   :  { %1821 = vmatpush3.bf16.msra.mxu1 %v1206_v36  ;;  %1822 = vmatprep.mubr.msk.bf16.mxu1 %vm2052_vm0, %v2051_v0 }
 0x594   :  { %1832 = vmatprep.subr.bf16.mxu1 %v2051_v0 }
 0x59a   :  { %1823 = vmatmul.mubr.msk.bf16.vlgmr.msra.gmra.mrb[44].mxu1 %vm206_vm2, %v715_v39  ;;  %v1626_v39 = vld [vmem:[%s2499_s6] ss:$0 sm:$0xff] }
 0x59b   :  { %1836 = vmatprep.mubr.msk.bf16.mxu1 %vm2052_vm0, %v2051_v0  ;;  %1833 = vmatpush3.bf16.msra.mxu1 %v1879_v13 }
 0x59c   :  { %1834 = vmatprep.subr.bf16.mxu1 %v2051_v0 }
 0x59f   :  { %1835 = vmatpush3.bf16.msra.mxu1 %v1880_v15 }
 0x611   :  { %v1194_v42 = vpop.f32.mrb[28].mxu0 }
 0x612   :  { %v1818_v43 = vpop.f32.mrb[29].mxu0 }
 0x613   :  { %v1197_v44 = vpop.f32.mrb[30].mxu0 }
 0x614   :  { %v1819_v45 = vpop.f32.mrb[31].mxu0  ;;  %v1883_v44 = vld [vmem:[%s2502_s9 + $0x10] sm:$0xff]  }
 0x615   :  { %v1884_v45 = vld [vmem:[%s2502_s9 + $0x18] sm:$0xff]  }
 0x665   :  { %v1143_v46 = vpop.f32.mrb[40].mxu1 }
 0x666   :  { %v1150_v47 = vadd.f32 %v1143_v46, %v998_v24  ;;  %v1812_v48 = vpop.f32.mrb[41].mxu1  ;;  %v1627_v46 = vld [vmem:[%s2501_s8] ss:$0 sm:$0xff] }
 0x667   :  { %v1146_v49 = vpop.f32.mrb[42].mxu1 }
 0x668   :  { %v1151_v50 = vadd.f32 %v1146_v49, %v1001_v27  ;;  %v1813_v51 = vpop.f32.mrb[43].mxu1 }
 0x66d   :  { %v1242_v52 = vpop.f32.mrb[44].mxu1 }
 0x66e   :  { %v1248_v53 = vpack.c.bf16 %v1242_v52, %v1194_v42  ;;  %v1824_v54 = vpop.f32.mrb[45].mxu1 }
 0x66f   :  { %v1245_v55 = vpop.f32.mrb[46].mxu1 }
 0x670   :  { %v1825_v56 = vpop.f32.mrb[47].mxu1  ;;  %1829 = vmatmul.mubr.msk.bf16.vlgmr.msra.gmra.mrb[32].mxu0 %vm206_vm2, %v1248_v53 }
 0x671   :  { %1848 = vmatprep.mubr.msk.bf16.mxu0 %vm2052_vm0, %v2051_v0  ;;  %1841 = vmatpush3.bf16.msra.mxu0 %v1881_v14 }
 0x672   :  { %1842 = vmatprep.subr.bf16.mxu0 %v2051_v0 }
 0x675   :  { %1843 = vmatpush3.bf16.msra.mxu0 %v1882_v16 }
 0x676   :  { %1844 = vmatprep.subr.bf16.mxu0 %v2051_v0 }
 0x679   :  { %1845 = vmatpush3.bf16.msra.mxu0 %v1883_v44 }
 0x67a   :  { %1846 = vmatprep.subr.bf16.mxu0 %v2051_v0  ;;  %v1631_v0 = vld [vmem:[%s2503_s10] ss:$0 sm:$0xff] }
 0x67d   :  { %1847 = vmatpush3.bf16.msra.mxu0 %v1884_v45 }
 0x743   :  { %v1291_v58 = vpop.f32.mrb[32].mxu0 }
 0x744   :  { %v1298_v60 = vadd.f32 %v1291_v58, %v1150_v47  ;;  %v1830_v61 = vpop.f32.mrb[33].mxu0 }
 0x745   :  { %v1294_v62 = vpop.f32.mrb[34].mxu0 }
 0x746   :  { %v1307_v63 = vadd.f32 %v1624_v59, %v1298_v60  ;;  %v1299_v11 = vadd.f32 %v1294_v62, %v1151_v50  ;;  %v1831_v1 = vpop.f32.mrb[35].mxu0 }
 0x748   :  { %v1317_v3 = vadd.f32 %v1312_v57, %v1307_v63  ;;  %v1308_v4 = vadd.f32 %v1624_v59, %v1299_v11 }
 0x74a   :  { %v1318_v5 = vadd.f32 %v1314_v2, %v1308_v4  ;;  %v1322_v7 = vsel %vm1321_vm6, %v1317_v3, 0.0  ;;  %v1331_v6 = vmul.f32 %v1317_v3, %v1317_v3 }
 0x74b   :  { %1323 = vadd.xlane.f32.xlu0 %v1322_v7 }
 0x74c   :  { %v1325_v8 = vsel %vm1321_vm6, %v1318_v5, 0.0  ;;  %v1333_v9 = vsel %vm1321_vm6, %v1331_v6, 0.0  ;;  %v1332_v10 = vmul.f32 %v1318_v5, %v1318_v5 }
 0x74d   :  { %1326 = vadd.xlane.f32.xlu1 %v1325_v8 }
 0x74e   :  { %v1336_v12 = vsel %vm1321_vm6, %v1332_v10, 0.0 }
 0x74f   :  { %1334 = vadd.xlane.f32.xlu0 %v1333_v9 }
 0x753   :  { %1337 = vadd.xlane.f32.xlu0 %v1336_v12 }
 0x7d8   :  { %v1324_v17 = vpop.xlane.xlu0 %1323 }
 0x7d9   :  { %v1329_v18 = vmul.f32 0.03125, %v1324_v17 }
 0x7da   :  { %v1327_v19 = vpop.xlane.xlu1 %1326 }
 0x7db   :  { %v1341_v21 = vmul.f32 %v1329_v18, %v1329_v18  ;;  %v1330_v22 = vmul.f32 0.03125, %v1327_v19  ;;  %v1345_v30 = vsub.f32 %v1317_v3, %v1329_v18 }
 0x7dc   :  { %v1335_v20 = vpop.xlane.xlu0 %1334 }
 0x7dd   :  { %v1339_v34 = vmul.f32 0.03125, %v1335_v20  ;;  %v1342_v25 = vmul.f32 %v1330_v22, %v1330_v22  ;;  %v1346_v35 = vsub.f32 %v1318_v5, %v1330_v22 }
 0x7df   :  { %v1343_v23 = vsub.f32 %v1339_v34, %v1341_v21  ;;  %v1637_v34 = vld [vmem:[%s2504_s11] ss:$0 sm:$0xff]  ;;  %s2013_s11 = scalar_lea.vmem %s1582_s29, 256 }
 0x7e0   :  { %v1338_v24 = vpop.xlane.xlu0 %1337  ;;  %p2014_p4 = scmp.ne.s32.totalorder %s1582_s29, %s2013_s11  ;;  %p2019_p6 = scmp.lt.s32.totalorder %s2013_s11, %s2013_s11 }
 0x7e1   :  { %v1347_v26 = vadd.f32 1e-05, %v1343_v23  ;;  %v1340_v27 = vmul.f32 0.03125, %v1338_v24 }
 0x7e2   :  { %p2020_p7 = por %p2019_p6, %p2018_p5 }
 0x7e3   :  { %1917 = vrsqrt.f32 %v1347_v26  ;;  %v1344_v28 = vsub.f32 %v1340_v27, %v1342_v25  ;;  %v1638_v26 = vld [vmem:[%s2505_s12] ss:$0 sm:$0xff] }
 0x7e4   :  { %p2021_p8 = pnand %p2020_p7, %p2014_p4 }
 0x7e5   :  { %v1348_v29 = vadd.f32 1e-05, %v1344_v28 }
 0x7e7   :  { %1919 = vrsqrt.f32 %v1348_v29 }
 0x7ed   :  { %v1918_v31 = vpop.eup %1917 }
 0x7ee   :  { %v1351_v32 = vmul.f32 %v1918_v31, %v1345_v30 }
 0x7f0   :  { %v1359_v38 = vmul.f32 %v1625_v33, %v1351_v32 }
 0x7f1   :  { %v1920_v36 = vpop.eup %1919 }
 0x7f2   :  { %v1352_v37 = vmul.f32 %v1920_v36, %v1346_v35  ;;  %v1367_v41 = vadd.f32 %v1626_v39, %v1359_v38 }
 0x7f4   :  { %v1360_v40 = vmul.f32 %v1625_v33, %v1352_v37 }
 0x7f6   :  { %v1368_v42 = vadd.f32 %v1626_v39, %v1360_v40 }
 0x7f8   :  { %v1369_v43 = vpack.c.bf16 %v1368_v42, %v1367_v41 }
 0x7fa   :  { %1837 = vmatmul.mubr.msk.bf16.vlgmr.msra.gmra.mrb[48].mxu1 %vm1321_vm6, %v1369_v43 }
 0x8cd   :  { %v1430_v47 = vpop.f32.mrb[48].mxu1 }
 0x8ce   :  { %v1431_v48 = vadd.f32 %v1627_v46, %v1430_v47  ;;  %v1838_v49 = vpop.f32.mrb[49].mxu1 }
 0x8cf   :  { %v1433_v50 = vpop.f32.mrb[50].mxu1 }
 0x8d0   :  { %v1434_v51 = vadd.f32 %v1627_v46, %v1433_v50  ;;  %v1839_v52 = vpop.f32.mrb[51].mxu1  ;;  %v1437_v53 = vmax.f32 %v1431_v48, 0.0 }
 0x8d2   :  { %v1438_v54 = vmax.f32 %v1434_v51, 0.0 }
 0x8d4   :  { %v1439_v55 = vpack.c.bf16 %v1438_v54, %v1437_v53 }
 0x8d6   :  { %1849 = vmatmul.mubr.msk.bf16.vlgmr.msra.gmra.mrb[36].mxu0 %vm1479_vm7, %v1439_v55 }
 0x9a9   :  { %v1517_v56 = vpop.f32.mrb[36].mxu0 }
 0x9aa   :  { %v1518_v57 = vadd.f32 %v1631_v0, %v1517_v56  ;;  %v1850_v58 = vpop.f32.mrb[37].mxu0 }
 0x9ab   :  { %v1520_v59 = vpop.f32.mrb[38].mxu0 }
 0x9ac   :  { %v1524_v60 = vadd.f32 %v1518_v57, %v1367_v41  ;;  %v1521_v61 = vadd.f32 %v1631_v0, %v1520_v59  ;;  %v1851_v62 = vpop.f32.mrb[39].mxu0 }
 0x9ae   :  { %v1525_v63 = vadd.f32 %v1521_v61, %v1368_v42  ;;  %v1528_v11 = vsel %vm1321_vm6, %v1524_v60, 0.0  ;;  %v1536_v1 = vmul.f32 %v1524_v60, %v1524_v60 }
 0x9af   :  { %1529 = vadd.xlane.f32.xlu1 %v1528_v11 }
 0x9b0   :  { %v1531_v2 = vsel %vm1321_vm6, %v1525_v63, 0.0  ;;  %v1537_v3 = vmul.f32 %v1525_v63, %v1525_v63  ;;  %v1538_v4 = vsel %vm1321_vm6, %v1536_v1, 0.0 }
 0x9b1   :  { %1532 = vadd.xlane.f32.xlu0 %v1531_v2 }
 0x9b2   :  { %v1541_v5 = vsel %vm1321_vm6, %v1537_v3, 0.0 }
 0x9b3   :  { %1539 = vadd.xlane.f32.xlu1 %v1538_v4 }
 0x9b5   :  { %1542 = vadd.xlane.f32.xlu0 %v1541_v5 }
 0xa3c   :  { %v1530_v7 = vpop.xlane.xlu1 %1529 }
 0xa3d   :  { %v1534_v6 = vmul.f32 0.03125, %v1530_v7 }
 0xa3e   :  { %v1533_v8 = vpop.xlane.xlu0 %1532 }
 0xa3f   :  { %v1535_v9 = vmul.f32 0.03125, %v1533_v8  ;;  %v1546_v12 = vmul.f32 %v1534_v6, %v1534_v6  ;;  %v1550_v21 = vsub.f32 %v1524_v60, %v1534_v6 }
 0xa40   :  { %v1540_v10 = vpop.xlane.xlu1 %1539 }
 0xa41   :  { %v1544_v13 = vmul.f32 0.03125, %v1540_v10  ;;  %v1547_v14 = vmul.f32 %v1535_v9, %v1535_v9  ;;  %v1551_v23 = vsub.f32 %v1525_v63, %v1535_v9 }
 0xa42   :  { %v1543_v15 = vpop.xlane.xlu0 %1542 }
 0xa43   :  { %v1548_v16 = vsub.f32 %v1544_v13, %v1546_v12  ;;  %v1545_v17 = vmul.f32 0.03125, %v1543_v15 }
 0xa45   :  { %v1552_v18 = vadd.f32 1e-05, %v1548_v16  ;;  %v1549_v19 = vsub.f32 %v1545_v17, %v1547_v14 }
 0xa47   :  { %1921 = vrsqrt.f32 %v1552_v18  ;;  %v1553_v20 = vadd.f32 1e-05, %v1549_v19 }
 0xa49   :  { %1923 = vrsqrt.f32 %v1553_v20 }
 0xa51   :  { %v1922_v22 = vpop.eup %1921 }
 0xa52   :  { %v1556_v24 = vmul.f32 %v1922_v22, %v1550_v21 }
 0xa53   :  { %v1924_v25 = vpop.eup %1923 }
 0xa54   :  { %v1557_v27 = vmul.f32 %v1924_v25, %v1551_v23  ;;  %v1564_v28 = vmul.f32 %v1637_v34, %v1556_v24 }
 0xa56   :  { %v1565_v29 = vmul.f32 %v1637_v34, %v1557_v27  ;;  %v1572_v30 = vadd.f32 %v1638_v26, %v1564_v28 }
 0xa58   :  { %v1573_v31 = vadd.f32 %v1638_v26, %v1565_v29  ;;  %1574 = vst.msk [vmem:[#allocation10] sm:$0xff] %vm1321_vm6, %v1572_v30 }
 0xa5a   :  { %1575 = vst.msk [vmem:[#allocation10 + $0x8] sm:$0xff] %vm1321_vm6, %v1573_v31 }
 0xa5b   :  { %2024 = shalt.err (!%p2021_p8)
}
 0xa5c   :  { %s2025_s30 = scalar_lea.hbm %s2506_s13, 256 }
 0xa5d   :  { %p2026_p9 = scmp.ne.s32.totalorder %s2506_s13, %s2025_s30  ;;  %p2029_p10 = scmp.lt.u32.totalorder %s2025_s30, %s2506_s13 }
 0xa5f   :  { %p2031_p11 = pnand %p2029_p10, %p2026_p9 }
 0xa61   :  { %2034 = shalt.err (!%p2031_p11)
}
 0xa62   :  { %1587 = dma.vmem_to_hbm [thread:$0]  %s1582_s29, 256, %s2506_s13, [#allocation4], %s2045_s20, %s2045_s20, %s2046_s21  }
 0xa63   :  { %2041 = dma.done.wait [#allocation4], 256  }
 0xa64   :  { %2042 = vsyncadd [#allocation4], 4294967040 }
 0xa65   :  { %1591 = vsyncpa [#allocation3], 1 }
 0xa66   :  { %1592 = vsyncpa [#allocation6], 1 }
 0xa67   :  { %1593 = vsyncpa [#allocation9], 1 }
 0xa68   :  { %1594 = vsyncpa [#allocation4], 1 }

</bundles_post_ra>
